<compile_context>
chip_gen: v7x
topology: tpu7x:2x2x1
jax: 0.10.0
libtpu: 0.0.40
codegen_flags: <defaults>
</compile_context>

<pallas_src>
import math

import jax
import jax.numpy as jnp
from jax import lax
from jax.experimental import pallas as pl
from jax.experimental.pallas import tpu as pltpu

# ----------------------- model dimensions (small, TPU-friendly) ---------------
B = 2          # batch
S = 16         # sequence length
H = 128        # hidden size
NH = 4         # num attention heads
HD = H // NH   # head dim = 32
F = 256        # FFN intermediate size
EPS = 1e-6
MM_DTYPE = jnp.bfloat16   # MXU operand dtype (bf16-native on v6e/v7x; helps v5e too)


# ----------------------------- fused Pallas kernel ----------------------------
def decoder_kernel(x_ref, mask_ref, inw_ref, wqkv_ref, cosq_ref, sinq_ref,
                   cosk_ref, sink_ref, wo_ref, pnw_ref, wgu_ref, wd_ref, o_ref):
    """Entire decoder layer in one grid step; batch folded into matmul rows."""
    x = x_ref[...]                                           # [B*S, H] f32

    # ---- RMSNorm (input) ----
    var = jnp.mean(x * x, axis=-1, keepdims=True)
    xn = x * lax.rsqrt(var + EPS) * inw_ref[...]

    # ---- fused QKV + rotate_half projections: one [B*S,H] @ [H,5H] matmul ----
    qkv = jnp.dot(xn.astype(MM_DTYPE), wqkv_ref[...],
                  preferred_element_type=jnp.float32)        # [B*S, 5H]
    q, q_rot = qkv[:, 0:H], qkv[:, H:2 * H]
    k, k_rot = qkv[:, 2 * H:3 * H], qkv[:, 3 * H:4 * H]
    v = qkv[:, 4 * H:5 * H]

    # ---- RoPE (f32 VPU); 1/sqrt(HD) already folded into cosq/sinq ----
    q = q * cosq_ref[...] + q_rot * sinq_ref[...]
    k = k * cosk_ref[...] + k_rot * sink_ref[...]

    # ---- self-attention: loop (batch, head) only for the tiny score/PV matmuls
    mask = mask_ref[...]                                     # [S, S] additive mask
    attn_rows = []
    for b in range(B):                                       # static unroll, B=2
        r0 = b * S
        head_outs = []
        for h in range(NH):                                  # static unroll, NH=4
            lo = h * HD
            qh = q[r0:r0 + S, lo:lo + HD]                    # [S, HD]
            kh = k[r0:r0 + S, lo:lo + HD]
            vh = v[r0:r0 + S, lo:lo + HD]
            # trans_b-style matmul: contract last dim of both (no explicit kh.T)
            s = lax.dot_general(qh, kh, (((1,), (1,)), ((), ())),
                                preferred_element_type=jnp.float32) + mask
            s = s - jnp.max(s, axis=-1, keepdims=True)
            p = jnp.exp(s)
            p = p * pl.reciprocal(jnp.sum(p, axis=-1, keepdims=True), approx=False)
            head_outs.append(jnp.dot(p, vh, preferred_element_type=jnp.float32))
        attn_rows.append(jnp.concatenate(head_outs, axis=-1))   # [S, H]
    attn = jnp.concatenate(attn_rows, axis=0)                   # [B*S, H]

    # ---- output projection: one full-K matmul, residual added once ----
    h1 = x + jnp.dot(attn.astype(MM_DTYPE), wo_ref[...],
                     preferred_element_type=jnp.float32)

    # ---- RMSNorm (post-attention) + fused SwiGLU MLP + residual ----
    var2 = jnp.mean(h1 * h1, axis=-1, keepdims=True)
    hn = h1 * lax.rsqrt(var2 + EPS) * pnw_ref[...]
    gu = jnp.dot(hn.astype(MM_DTYPE), wgu_ref[...],
                 preferred_element_type=jnp.float32)          # [B*S, 2F]
    g, u = gu[:, :F], gu[:, F:]
    act = g * jax.nn.sigmoid(g)                               # SiLU in f32
    mlp = jnp.dot((act * u).astype(MM_DTYPE), wd_ref[...],
                  preferred_element_type=jnp.float32)
    o_ref[...] = h1 + mlp


# ----------------------------- one-time constant prep --------------------------
def prepare_decoder_constants(params, rotary_emb):
    """Hoisted host-side prep: fused weights, tiled cos/sin, scale folding."""
    cos_hd, sin_hd = rotary_emb                               # [S, HD]
    cos = jnp.tile(cos_hd, (1, NH))                           # [S, H] per-head tiled
    sin = jnp.tile(sin_hd, (1, NH))
    cos_bs = jnp.tile(cos, (B, 1))                            # [B*S, H]
    sin_bs = jnp.tile(sin, (B, 1))
    scale = 1.0 / math.sqrt(HD)

    # rotate_half as a fixed block-diagonal signed permutation: x @ R == rotate_half(x)
    half = HD // 2
    r = jnp.zeros((HD, HD), jnp.float32)
    r = r.at[:half, half:].set(jnp.eye(half))
    r = r.at[half:, :half].set(-jnp.eye(half))
    rot = jnp.kron(jnp.eye(NH, dtype=jnp.float32), r)         # [H, H]

    wq, wk, wv = params["wq"], params["wk"], params["wv"]
    wqkv = jnp.concatenate([wq, wq @ rot, wk, wk @ rot, wv], axis=1)   # [H, 5H]
    wgu = jnp.concatenate([params["wg"], params["wu"]], axis=1)        # [H, 2F]

    return {
        "in_norm": params["in_norm"],
        "post_norm": params["post_norm"],
        "wqkv": wqkv.astype(MM_DTYPE),
        "wo": params["wo"].astype(MM_DTYPE),
        "wgu": wgu.astype(MM_DTYPE),
        "wd": params["wd"].astype(MM_DTYPE),
        "cos_q": cos_bs * scale,     # 1/sqrt(HD) folded into the q-side rotary
        "sin_q": sin_bs * scale,
        "cos_k": cos_bs,
        "sin_k": sin_bs,
    }


# ------------------------------- forward wrapper --------------------------------
def _full(shape):
    """BlockSpec covering the full array (single grid step)."""
    n = len(shape)
    return pl.BlockSpec(shape, lambda i, _n=n: (0,) * _n)


@jax.jit
def vlm_decoder_forward(hidden_states, consts, attention_mask):
    """hidden_states: [B, S, H] f32; attention_mask: [S, S] additive mask."""
    x2d = hidden_states.reshape(B * S, H)                     # batch folded into rows
    out = pl.pallas_call(
        decoder_kernel,
        out_shape=jax.ShapeDtypeStruct((B * S, H), jnp.float32),
        grid=(1,),
        in_specs=[
            _full((B * S, H)),        # hidden_states (batch-folded)
            _full((S, S)),            # attention_mask
            _full((1, H)),            # input RMSNorm weight
            _full((H, 5 * H)),        # fused [wq | wq@rot | wk | wk@rot | wv]
            _full((B * S, H)),        # cos (q side, pre-scaled)
            _full((B * S, H)),        # sin (q side, pre-scaled)
            _full((B * S, H)),        # cos (k side)
            _full((B * S, H)),        # sin (k side)
            _full((H, H)),            # wo
            _full((1, H)),            # post-attention RMSNorm weight
            _full((H, 2 * F)),        # fused [wg | wu]
            _full((F, H)),            # wd
        ],
        out_specs=_full((B * S, H)),
        # Single fat step; on v7x this trades 2-TC batch sharding for full MXU
        # rows + no per-step overhead (review: measure both at larger sizes).
        compiler_params=pltpu.CompilerParams(dimension_semantics=("arbitrary",)),
    )(x2d, attention_mask, consts["in_norm"], consts["wqkv"], consts["cos_q"],
      consts["sin_q"], consts["cos_k"], consts["sin_k"], consts["wo"],
      consts["post_norm"], consts["wgu"], consts["wd"])
    return out.reshape(B, S, H)


# --------------------------- pure-JAX reference ---------------------------------
def reference_forward(x, params, rotary_emb, mask, mm_dtype=jnp.float32):
    cos_hd, sin_hd = rotary_emb

    def mm(a, w):
        return jnp.dot(a.astype(mm_dtype), w.astype(mm_dtype),
                       preferred_element_type=jnp.float32)

    def rmsnorm(t, w):
        return t * lax.rsqrt(jnp.mean(t * t, -1, keepdims=True) + EPS) * w

    xn = rmsnorm(x, params["in_norm"][0])
    q = mm(xn, params["wq"])
    k = mm(xn, params["wk"])
    v = mm(xn, params["wv"])

    def rope(t):
        t4 = t.reshape(B, S, NH, HD)
        half = HD // 2
        rot = jnp.concatenate([-t4[..., half:], t4[..., :half]], axis=-1)
        return (t4 * cos_hd[None, :, None, :] + rot * sin_hd[None, :, None, :]
                ).reshape(B, S, H)

    q, k = rope(q), rope(k)
    q4 = q.reshape(B, S, NH, HD).transpose(0, 2, 1, 3)
    k4 = k.reshape(B, S, NH, HD).transpose(0, 2, 1, 3)
    v4 = v.reshape(B, S, NH, HD).transpose(0, 2, 1, 3)
    s = jnp.einsum("bhqd,bhkd->bhqk", q4, k4) / math.sqrt(HD) + mask
    p = jax.nn.softmax(s, axis=-1)
    o = jnp.einsum("bhqk,bhkd->bhqd", p, v4).transpose(0, 2, 1, 3).reshape(B, S, H)
    h1 = x + mm(o, params["wo"])
    hn = rmsnorm(h1, params["post_norm"][0])
    mlp = mm(jax.nn.silu(mm(hn, params["wg"])) * mm(hn, params["wu"]), params["wd"])
    return h1 + mlp


# ------------------------------------ main ---------------------------------------
if __name__ == "__main__":
    key = jax.random.PRNGKey(0)
    ks = jax.random.split(key, 10)
    std = 0.02
    params = {
        "in_norm":   jnp.ones((1, H), jnp.float32),
        "post_norm": jnp.ones((1, H), jnp.float32),
        "wq": std * jax.random.normal(ks[0], (H, H), jnp.float32),
        "wk": std * jax.random.normal(ks[1], (H, H), jnp.float32),
        "wv": std * jax.random.normal(ks[2], (H, H), jnp.float32),
        "wo": std * jax.random.normal(ks[3], (H, H), jnp.float32),
        "wg": std * jax.random.normal(ks[4], (H, F), jnp.float32),
        "wu": std * jax.random.normal(ks[5], (H, F), jnp.float32),
        "wd": std * jax.random.normal(ks[6], (F, H), jnp.float32),
    }
    hidden_states = jax.random.normal(ks[7], (B, S, H), jnp.float32)

    # rotary embedding (cos, sin) as passed into VLMDecoder.forward
    inv_freq = 1.0 / (10000.0 ** (jnp.arange(0, HD, 2, dtype=jnp.float32) / HD))
    pos = jnp.arange(S, dtype=jnp.float32)
    freqs = jnp.einsum("s,d->sd", pos, inv_freq)              # [S, HD/2]
    emb = jnp.concatenate([freqs, freqs], axis=-1)            # [S, HD]
    rotary_emb = (jnp.cos(emb), jnp.sin(emb))

    # causal additive attention mask [S, S]
    causal = jnp.tril(jnp.ones((S, S), jnp.bool_))
    attention_mask = jnp.where(causal, 0.0, -1e9).astype(jnp.float32)

    # TODO(synk): past_key_value / VLMCache update, cache_position and the LoRA
    # input_args are KV-cache / adapter bookkeeping on the PyTorch side and are
    # not modeled here.
    consts = prepare_decoder_constants(params, rotary_emb)    # hoisted, computed once
    out = vlm_decoder_forward(hidden_states, consts, attention_mask)
    out = jax.block_until_ready(out)

    # Tight parity vs a reference with matching bf16 MXU operands, plus a loose
    # sanity check vs the pure-f32 reference (bf16 operand rounding ~1e-3).
    ref_bf16 = reference_forward(hidden_states, params, rotary_emb, attention_mask,
                                 mm_dtype=MM_DTYPE)
    ref_f32 = reference_forward(hidden_states, params, rotary_emb, attention_mask,
                                mm_dtype=jnp.float32)
    assert out.shape == (B, S, H)
    assert jnp.allclose(out, ref_bf16, rtol=2e-3, atol=2e-3), "mismatch vs bf16-matmul reference"
    assert jnp.allclose(out, ref_f32, rtol=5e-2, atol=5e-2), "mismatch vs f32 reference"

    print("KERNEL_OK")
</pallas_src>

<mosaic_0001>
module attributes {stable_mosaic.version = 11 : i64} {
  func.func @decoder_kernel(%arg0: i32, %arg1: memref<32x128xf32, #tpu.memory_space<vmem>>, %arg2: memref<16x16xf32, #tpu.memory_space<vmem>>, %arg3: memref<1x128xf32, #tpu.memory_space<vmem>>, %arg4: memref<128x640xbf16, #tpu.memory_space<vmem>>, %arg5: memref<32x128xf32, #tpu.memory_space<vmem>>, %arg6: memref<32x128xf32, #tpu.memory_space<vmem>>, %arg7: memref<32x128xf32, #tpu.memory_space<vmem>>, %arg8: memref<32x128xf32, #tpu.memory_space<vmem>>, %arg9: memref<128x128xbf16, #tpu.memory_space<vmem>>, %arg10: memref<1x128xf32, #tpu.memory_space<vmem>>, %arg11: memref<128x512xbf16, #tpu.memory_space<vmem>>, %arg12: memref<256x128xbf16, #tpu.memory_space<vmem>>, %arg13: memref<32x128xf32, #tpu.memory_space<vmem>>) attributes {dimension_semantics = [#tpu.dimension_semantics<arbitrary>], iteration_bounds = array<i64: 1>, scalar_prefetch = 0 : i64, scratch_operands = 0 : i64, tpu.core_type = #tpu.core_type<tc>, window_params = [{pipeline_mode = #tpu.pipeline_mode<synchronous>, transform_indices = @transform_0, window_bounds = array<i64: 32, 128>}, {pipeline_mode = #tpu.pipeline_mode<synchronous>, transform_indices = @transform_1, window_bounds = array<i64: 16, 16>}, {pipeline_mode = #tpu.pipeline_mode<synchronous>, transform_indices = @transform_2, window_bounds = array<i64: 1, 128>}, {pipeline_mode = #tpu.pipeline_mode<synchronous>, transform_indices = @transform_3, window_bounds = array<i64: 128, 640>}, {pipeline_mode = #tpu.pipeline_mode<synchronous>, transform_indices = @transform_4, window_bounds = array<i64: 32, 128>}, {pipeline_mode = #tpu.pipeline_mode<synchronous>, transform_indices = @transform_5, window_bounds = array<i64: 32, 128>}, {pipeline_mode = #tpu.pipeline_mode<synchronous>, transform_indices = @transform_6, window_bounds = array<i64: 32, 128>}, {pipeline_mode = #tpu.pipeline_mode<synchronous>, transform_indices = @transform_7, window_bounds = array<i64: 32, 128>}, {pipeline_mode = #tpu.pipeline_mode<synchronous>, transform_indices = @transform_8, window_bounds = array<i64: 128, 128>}, {pipeline_mode = #tpu.pipeline_mode<synchronous>, transform_indices = @transform_9, window_bounds = array<i64: 1, 128>}, {pipeline_mode = #tpu.pipeline_mode<synchronous>, transform_indices = @transform_10, window_bounds = array<i64: 128, 512>}, {pipeline_mode = #tpu.pipeline_mode<synchronous>, transform_indices = @transform_11, window_bounds = array<i64: 256, 128>}, {pipeline_mode = #tpu.pipeline_mode<synchronous>, transform_indices = @transform_12, window_bounds = array<i64: 32, 128>}]} {
    %c0 = arith.constant 0 : index
    %c0_0 = arith.constant 0 : index
    %0 = vector.load %arg1[%c0, %c0_0] : memref<32x128xf32, #tpu.memory_space<vmem>>, vector<32x128xf32>
    %1 = arith.mulf %0, %0 : vector<32x128xf32>
    %cst = arith.constant dense<0.000000e+00> : vector<32xf32>
    %2 = vector.multi_reduction <add>, %1, %cst [1] : vector<32x128xf32> to vector<32xf32>
    %3 = vector.shape_cast %2 : vector<32xf32> to vector<32x1xf32>
    %cst_1 = arith.constant 1.280000e+02 : f32
    %4 = vector.broadcast %cst_1 : f32 to vector<32x1xf32>
    %5 = arith.divf %3, %4 : vector<32x1xf32>
    %cst_2 = arith.constant 9.99999997E-7 : f32
    %6 = vector.broadcast %cst_2 : f32 to vector<32x1xf32>
    %7 = arith.addf %5, %6 : vector<32x1xf32>
    %8 = math.rsqrt %7 : vector<32x1xf32>
    %9 = vector.broadcast %8 : vector<32x1xf32> to vector<32x128xf32>
    %10 = arith.mulf %0, %9 : vector<32x128xf32>
    %c0_3 = arith.constant 0 : index
    %c0_4 = arith.constant 0 : index
    %11 = vector.load %arg3[%c0_3, %c0_4] : memref<1x128xf32, #tpu.memory_space<vmem>>, vector<1x128xf32>
    %12 = vector.broadcast %11 : vector<1x128xf32> to vector<32x128xf32>
    %13 = arith.mulf %10, %12 : vector<32x128xf32>
    %14 = arith.truncf %13 : vector<32x128xf32> to vector<32x128xbf16>
    %c0_5 = arith.constant 0 : index
    %c0_6 = arith.constant 0 : index
    %15 = vector.load %arg4[%c0_5, %c0_6] : memref<128x640xbf16, #tpu.memory_space<vmem>>, vector<128x640xbf16>
    %cst_7 = arith.constant dense<0.000000e+00> : vector<32x640xf32>
    %16 = tpu.matmul %14, %15, %cst_7 {dimension_numbers = #tpu.dot_dimension_numbers<[1], [0], [0], [1], [0, 0, 1, 1], [], []>} : vector<32x128xbf16>, vector<128x640xbf16>, vector<32x640xf32> -> vector<32x640xf32>
    %17 = vector.extract_strided_slice %16 {offsets = [0, 0], sizes = [32, 128], strides = [1, 1]} : vector<32x640xf32> to vector<32x128xf32>
    %18 = vector.extract_strided_slice %16 {offsets = [0, 128], sizes = [32, 128], strides = [1, 1]} : vector<32x640xf32> to vector<32x128xf32>
    %19 = vector.extract_strided_slice %16 {offsets = [0, 256], sizes = [32, 128], strides = [1, 1]} : vector<32x640xf32> to vector<32x128xf32>
    %20 = vector.extract_strided_slice %16 {offsets = [0, 384], sizes = [32, 128], strides = [1, 1]} : vector<32x640xf32> to vector<32x128xf32>
    %21 = vector.extract_strided_slice %16 {offsets = [0, 512], sizes = [32, 128], strides = [1, 1]} : vector<32x640xf32> to vector<32x128xf32>
    %c0_8 = arith.constant 0 : index
    %c0_9 = arith.constant 0 : index
    %22 = vector.load %arg5[%c0_8, %c0_9] : memref<32x128xf32, #tpu.memory_space<vmem>>, vector<32x128xf32>
    %23 = arith.mulf %17, %22 : vector<32x128xf32>
    %c0_10 = arith.constant 0 : index
    %c0_11 = arith.constant 0 : index
    %24 = vector.load %arg6[%c0_10, %c0_11] : memref<32x128xf32, #tpu.memory_space<vmem>>, vector<32x128xf32>
    %25 = arith.mulf %18, %24 : vector<32x128xf32>
    %26 = arith.addf %23, %25 : vector<32x128xf32>
    %c0_12 = arith.constant 0 : index
    %c0_13 = arith.constant 0 : index
    %27 = vector.load %arg7[%c0_12, %c0_13] : memref<32x128xf32, #tpu.memory_space<vmem>>, vector<32x128xf32>
    %28 = arith.mulf %19, %27 : vector<32x128xf32>
    %c0_14 = arith.constant 0 : index
    %c0_15 = arith.constant 0 : index
    %29 = vector.load %arg8[%c0_14, %c0_15] : memref<32x128xf32, #tpu.memory_space<vmem>>, vector<32x128xf32>
    %30 = arith.mulf %20, %29 : vector<32x128xf32>
    %31 = arith.addf %28, %30 : vector<32x128xf32>
    %c0_16 = arith.constant 0 : index
    %c0_17 = arith.constant 0 : index
    %32 = vector.load %arg2[%c0_16, %c0_17] : memref<16x16xf32, #tpu.memory_space<vmem>>, vector<16x16xf32>
    %33 = vector.extract_strided_slice %26 {offsets = [0, 0], sizes = [16, 32], strides = [1, 1]} : vector<32x128xf32> to vector<16x32xf32>
    %34 = vector.extract_strided_slice %31 {offsets = [0, 0], sizes = [16, 32], strides = [1, 1]} : vector<32x128xf32> to vector<16x32xf32>
    %35 = vector.extract_strided_slice %21 {offsets = [0, 0], sizes = [16, 32], strides = [1, 1]} : vector<32x128xf32> to vector<16x32xf32>
    %cst_18 = arith.constant dense<0.000000e+00> : vector<16x16xf32>
    %36 = tpu.matmul %33, %34, %cst_18 {dimension_numbers = #tpu.dot_dimension_numbers<[1], [1], [0], [0], [0, 0, 1, 0], [], []>} : vector<16x32xf32>, vector<16x32xf32>, vector<16x16xf32> -> vector<16x16xf32>
    %37 = arith.addf %36, %32 : vector<16x16xf32>
    %cst_19 = arith.constant dense<0xFF800000> : vector<16xf32>
    %38 = vector.multi_reduction <maximumf>, %37, %cst_19 [1] : vector<16x16xf32> to vector<16xf32>
    %39 = vector.shape_cast %38 : vector<16xf32> to vector<16x1xf32>
    %40 = vector.broadcast %39 : vector<16x1xf32> to vector<16x16xf32>
    %41 = arith.subf %37, %40 : vector<16x16xf32>
    %42 = math.exp %41 : vector<16x16xf32>
    %cst_20 = arith.constant dense<0.000000e+00> : vector<16xf32>
    %43 = vector.multi_reduction <add>, %42, %cst_20 [1] : vector<16x16xf32> to vector<16xf32>
    %44 = vector.shape_cast %43 : vector<16xf32> to vector<16x1xf32>
    %45 = tpu.reciprocal %44 : vector<16x1xf32> -> vector<16x1xf32>
    %46 = vector.broadcast %45 : vector<16x1xf32> to vector<16x16xf32>
    %47 = arith.mulf %42, %46 : vector<16x16xf32>
    %cst_21 = arith.constant dense<0.000000e+00> : vector<16x32xf32>
    %48 = tpu.matmul %47, %35, %cst_21 {dimension_numbers = #tpu.dot_dimension_numbers<[1], [0], [0], [1], [0, 0, 1, 1], [], []>} : vector<16x16xf32>, vector<16x32xf32>, vector<16x32xf32> -> vector<16x32xf32>
    %49 = vector.extract_strided_slice %26 {offsets = [0, 32], sizes = [16, 32], strides = [1, 1]} : vector<32x128xf32> to vector<16x32xf32>
    %50 = vector.extract_strided_slice %31 {offsets = [0, 32], sizes = [16, 32], strides = [1, 1]} : vector<32x128xf32> to vector<16x32xf32>
    %51 = vector.extract_strided_slice %21 {offsets = [0, 32], sizes = [16, 32], strides = [1, 1]} : vector<32x128xf32> to vector<16x32xf32>
    %cst_22 = arith.constant dense<0.000000e+00> : vector<16x16xf32>
    %52 = tpu.matmul %49, %50, %cst_22 {dimension_numbers = #tpu.dot_dimension_numbers<[1], [1], [0], [0], [0, 0, 1, 0], [], []>} : vector<16x32xf32>, vector<16x32xf32>, vector<16x16xf32> -> vector<16x16xf32>
    %53 = arith.addf %52, %32 : vector<16x16xf32>
    %cst_23 = arith.constant dense<0xFF800000> : vector<16xf32>
    %54 = vector.multi_reduction <maximumf>, %53, %cst_23 [1] : vector<16x16xf32> to vector<16xf32>
    %55 = vector.shape_cast %54 : vector<16xf32> to vector<16x1xf32>
    %56 = vector.broadcast %55 : vector<16x1xf32> to vector<16x16xf32>
    %57 = arith.subf %53, %56 : vector<16x16xf32>
    %58 = math.exp %57 : vector<16x16xf32>
    %cst_24 = arith.constant dense<0.000000e+00> : vector<16xf32>
    %59 = vector.multi_reduction <add>, %58, %cst_24 [1] : vector<16x16xf32> to vector<16xf32>
    %60 = vector.shape_cast %59 : vector<16xf32> to vector<16x1xf32>
    %61 = tpu.reciprocal %60 : vector<16x1xf32> -> vector<16x1xf32>
    %62 = vector.broadcast %61 : vector<16x1xf32> to vector<16x16xf32>
    %63 = arith.mulf %58, %62 : vector<16x16xf32>
    %cst_25 = arith.constant dense<0.000000e+00> : vector<16x32xf32>
    %64 = tpu.matmul %63, %51, %cst_25 {dimension_numbers = #tpu.dot_dimension_numbers<[1], [0], [0], [1], [0, 0, 1, 1], [], []>} : vector<16x16xf32>, vector<16x32xf32>, vector<16x32xf32> -> vector<16x32xf32>
    %65 = vector.extract_strided_slice %26 {offsets = [0, 64], sizes = [16, 32], strides = [1, 1]} : vector<32x128xf32> to vector<16x32xf32>
    %66 = vector.extract_strided_slice %31 {offsets = [0, 64], sizes = [16, 32], strides = [1, 1]} : vector<32x128xf32> to vector<16x32xf32>
    %67 = vector.extract_strided_slice %21 {offsets = [0, 64], sizes = [16, 32], strides = [1, 1]} : vector<32x128xf32> to vector<16x32xf32>
    %cst_26 = arith.constant dense<0.000000e+00> : vector<16x16xf32>
    %68 = tpu.matmul %65, %66, %cst_26 {dimension_numbers = #tpu.dot_dimension_numbers<[1], [1], [0], [0], [0, 0, 1, 0], [], []>} : vector<16x32xf32>, vector<16x32xf32>, vector<16x16xf32> -> vector<16x16xf32>
    %69 = arith.addf %68, %32 : vector<16x16xf32>
    %cst_27 = arith.constant dense<0xFF800000> : vector<16xf32>
    %70 = vector.multi_reduction <maximumf>, %69, %cst_27 [1] : vector<16x16xf32> to vector<16xf32>
    %71 = vector.shape_cast %70 : vector<16xf32> to vector<16x1xf32>
    %72 = vector.broadcast %71 : vector<16x1xf32> to vector<16x16xf32>
    %73 = arith.subf %69, %72 : vector<16x16xf32>
    %74 = math.exp %73 : vector<16x16xf32>
    %cst_28 = arith.constant dense<0.000000e+00> : vector<16xf32>
    %75 = vector.multi_reduction <add>, %74, %cst_28 [1] : vector<16x16xf32> to vector<16xf32>
    %76 = vector.shape_cast %75 : vector<16xf32> to vector<16x1xf32>
    %77 = tpu.reciprocal %76 : vector<16x1xf32> -> vector<16x1xf32>
    %78 = vector.broadcast %77 : vector<16x1xf32> to vector<16x16xf32>
    %79 = arith.mulf %74, %78 : vector<16x16xf32>
    %cst_29 = arith.constant dense<0.000000e+00> : vector<16x32xf32>
    %80 = tpu.matmul %79, %67, %cst_29 {dimension_numbers = #tpu.dot_dimension_numbers<[1], [0], [0], [1], [0, 0, 1, 1], [], []>} : vector<16x16xf32>, vector<16x32xf32>, vector<16x32xf32> -> vector<16x32xf32>
    %81 = vector.extract_strided_slice %26 {offsets = [0, 96], sizes = [16, 32], strides = [1, 1]} : vector<32x128xf32> to vector<16x32xf32>
    %82 = vector.extract_strided_slice %31 {offsets = [0, 96], sizes = [16, 32], strides = [1, 1]} : vector<32x128xf32> to vector<16x32xf32>
    %83 = vector.extract_strided_slice %21 {offsets = [0, 96], sizes = [16, 32], strides = [1, 1]} : vector<32x128xf32> to vector<16x32xf32>
    %cst_30 = arith.constant dense<0.000000e+00> : vector<16x16xf32>
    %84 = tpu.matmul %81, %82, %cst_30 {dimension_numbers = #tpu.dot_dimension_numbers<[1], [1], [0], [0], [0, 0, 1, 0], [], []>} : vector<16x32xf32>, vector<16x32xf32>, vector<16x16xf32> -> vector<16x16xf32>
    %85 = arith.addf %84, %32 : vector<16x16xf32>
    %cst_31 = arith.constant dense<0xFF800000> : vector<16xf32>
    %86 = vector.multi_reduction <maximumf>, %85, %cst_31 [1] : vector<16x16xf32> to vector<16xf32>
    %87 = vector.shape_cast %86 : vector<16xf32> to vector<16x1xf32>
    %88 = vector.broadcast %87 : vector<16x1xf32> to vector<16x16xf32>
    %89 = arith.subf %85, %88 : vector<16x16xf32>
    %90 = math.exp %89 : vector<16x16xf32>
    %cst_32 = arith.constant dense<0.000000e+00> : vector<16xf32>
    %91 = vector.multi_reduction <add>, %90, %cst_32 [1] : vector<16x16xf32> to vector<16xf32>
    %92 = vector.shape_cast %91 : vector<16xf32> to vector<16x1xf32>
    %93 = tpu.reciprocal %92 : vector<16x1xf32> -> vector<16x1xf32>
    %94 = vector.broadcast %93 : vector<16x1xf32> to vector<16x16xf32>
    %95 = arith.mulf %90, %94 : vector<16x16xf32>
    %cst_33 = arith.constant dense<0.000000e+00> : vector<16x32xf32>
    %96 = tpu.matmul %95, %83, %cst_33 {dimension_numbers = #tpu.dot_dimension_numbers<[1], [0], [0], [1], [0, 0, 1, 1], [], []>} : vector<16x16xf32>, vector<16x32xf32>, vector<16x32xf32> -> vector<16x32xf32>
    %97 = tpu.concatenate %48, %64, %80, %96 in 1 : vector<16x32xf32>, vector<16x32xf32>, vector<16x32xf32>, vector<16x32xf32> -> vector<16x128xf32>
    %98 = vector.extract_strided_slice %26 {offsets = [16, 0], sizes = [16, 32], strides = [1, 1]} : vector<32x128xf32> to vector<16x32xf32>
    %99 = vector.extract_strided_slice %31 {offsets = [16, 0], sizes = [16, 32], strides = [1, 1]} : vector<32x128xf32> to vector<16x32xf32>
    %100 = vector.extract_strided_slice %21 {offsets = [16, 0], sizes = [16, 32], strides = [1, 1]} : vector<32x128xf32> to vector<16x32xf32>
    %cst_34 = arith.constant dense<0.000000e+00> : vector<16x16xf32>
    %101 = tpu.matmul %98, %99, %cst_34 {dimension_numbers = #tpu.dot_dimension_numbers<[1], [1], [0], [0], [0, 0, 1, 0], [], []>} : vector<16x32xf32>, vector<16x32xf32>, vector<16x16xf32> -> vector<16x16xf32>
    %102 = arith.addf %101, %32 : vector<16x16xf32>
    %cst_35 = arith.constant dense<0xFF800000> : vector<16xf32>
    %103 = vector.multi_reduction <maximumf>, %102, %cst_35 [1] : vector<16x16xf32> to vector<16xf32>
    %104 = vector.shape_cast %103 : vector<16xf32> to vector<16x1xf32>
    %105 = vector.broadcast %104 : vector<16x1xf32> to vector<16x16xf32>
    %106 = arith.subf %102, %105 : vector<16x16xf32>
    %107 = math.exp %106 : vector<16x16xf32>
    %cst_36 = arith.constant dense<0.000000e+00> : vector<16xf32>
    %108 = vector.multi_reduction <add>, %107, %cst_36 [1] : vector<16x16xf32> to vector<16xf32>
    %109 = vector.shape_cast %108 : vector<16xf32> to vector<16x1xf32>
    %110 = tpu.reciprocal %109 : vector<16x1xf32> -> vector<16x1xf32>
    %111 = vector.broadcast %110 : vector<16x1xf32> to vector<16x16xf32>
    %112 = arith.mulf %107, %111 : vector<16x16xf32>
    %cst_37 = arith.constant dense<0.000000e+00> : vector<16x32xf32>
    %113 = tpu.matmul %112, %100, %cst_37 {dimension_numbers = #tpu.dot_dimension_numbers<[1], [0], [0], [1], [0, 0, 1, 1], [], []>} : vector<16x16xf32>, vector<16x32xf32>, vector<16x32xf32> -> vector<16x32xf32>
    %114 = vector.extract_strided_slice %26 {offsets = [16, 32], sizes = [16, 32], strides = [1, 1]} : vector<32x128xf32> to vector<16x32xf32>
    %115 = vector.extract_strided_slice %31 {offsets = [16, 32], sizes = [16, 32], strides = [1, 1]} : vector<32x128xf32> to vector<16x32xf32>
    %116 = vector.extract_strided_slice %21 {offsets = [16, 32], sizes = [16, 32], strides = [1, 1]} : vector<32x128xf32> to vector<16x32xf32>
    %cst_38 = arith.constant dense<0.000000e+00> : vector<16x16xf32>
    %117 = tpu.matmul %114, %115, %cst_38 {dimension_numbers = #tpu.dot_dimension_numbers<[1], [1], [0], [0], [0, 0, 1, 0], [], []>} : vector<16x32xf32>, vector<16x32xf32>, vector<16x16xf32> -> vector<16x16xf32>
    %118 = arith.addf %117, %32 : vector<16x16xf32>
    %cst_39 = arith.constant dense<0xFF800000> : vector<16xf32>
    %119 = vector.multi_reduction <maximumf>, %118, %cst_39 [1] : vector<16x16xf32> to vector<16xf32>
    %120 = vector.shape_cast %119 : vector<16xf32> to vector<16x1xf32>
    %121 = vector.broadcast %120 : vector<16x1xf32> to vector<16x16xf32>
    %122 = arith.subf %118, %121 : vector<16x16xf32>
    %123 = math.exp %122 : vector<16x16xf32>
    %cst_40 = arith.constant dense<0.000000e+00> : vector<16xf32>
    %124 = vector.multi_reduction <add>, %123, %cst_40 [1] : vector<16x16xf32> to vector<16xf32>
    %125 = vector.shape_cast %124 : vector<16xf32> to vector<16x1xf32>
    %126 = tpu.reciprocal %125 : vector<16x1xf32> -> vector<16x1xf32>
    %127 = vector.broadcast %126 : vector<16x1xf32> to vector<16x16xf32>
    %128 = arith.mulf %123, %127 : vector<16x16xf32>
    %cst_41 = arith.constant dense<0.000000e+00> : vector<16x32xf32>
    %129 = tpu.matmul %128, %116, %cst_41 {dimension_numbers = #tpu.dot_dimension_numbers<[1], [0], [0], [1], [0, 0, 1, 1], [], []>} : vector<16x16xf32>, vector<16x32xf32>, vector<16x32xf32> -> vector<16x32xf32>
    %130 = vector.extract_strided_slice %26 {offsets = [16, 64], sizes = [16, 32], strides = [1, 1]} : vector<32x128xf32> to vector<16x32xf32>
    %131 = vector.extract_strided_slice %31 {offsets = [16, 64], sizes = [16, 32], strides = [1, 1]} : vector<32x128xf32> to vector<16x32xf32>
    %132 = vector.extract_strided_slice %21 {offsets = [16, 64], sizes = [16, 32], strides = [1, 1]} : vector<32x128xf32> to vector<16x32xf32>
    %cst_42 = arith.constant dense<0.000000e+00> : vector<16x16xf32>
    %133 = tpu.matmul %130, %131, %cst_42 {dimension_numbers = #tpu.dot_dimension_numbers<[1], [1], [0], [0], [0, 0, 1, 0], [], []>} : vector<16x32xf32>, vector<16x32xf32>, vector<16x16xf32> -> vector<16x16xf32>
    %134 = arith.addf %133, %32 : vector<16x16xf32>
    %cst_43 = arith.constant dense<0xFF800000> : vector<16xf32>
    %135 = vector.multi_reduction <maximumf>, %134, %cst_43 [1] : vector<16x16xf32> to vector<16xf32>
    %136 = vector.shape_cast %135 : vector<16xf32> to vector<16x1xf32>
    %137 = vector.broadcast %136 : vector<16x1xf32> to vector<16x16xf32>
    %138 = arith.subf %134, %137 : vector<16x16xf32>
    %139 = math.exp %138 : vector<16x16xf32>
    %cst_44 = arith.constant dense<0.000000e+00> : vector<16xf32>
    %140 = vector.multi_reduction <add>, %139, %cst_44 [1] : vector<16x16xf32> to vector<16xf32>
    %141 = vector.shape_cast %140 : vector<16xf32> to vector<16x1xf32>
    %142 = tpu.reciprocal %141 : vector<16x1xf32> -> vector<16x1xf32>
    %143 = vector.broadcast %142 : vector<16x1xf32> to vector<16x16xf32>
    %144 = arith.mulf %139, %143 : vector<16x16xf32>
    %cst_45 = arith.constant dense<0.000000e+00> : vector<16x32xf32>
    %145 = tpu.matmul %144, %132, %cst_45 {dimension_numbers = #tpu.dot_dimension_numbers<[1], [0], [0], [1], [0, 0, 1, 1], [], []>} : vector<16x16xf32>, vector<16x32xf32>, vector<16x32xf32> -> vector<16x32xf32>
    %146 = vector.extract_strided_slice %26 {offsets = [16, 96], sizes = [16, 32], strides = [1, 1]} : vector<32x128xf32> to vector<16x32xf32>
    %147 = vector.extract_strided_slice %31 {offsets = [16, 96], sizes = [16, 32], strides = [1, 1]} : vector<32x128xf32> to vector<16x32xf32>
    %148 = vector.extract_strided_slice %21 {offsets = [16, 96], sizes = [16, 32], strides = [1, 1]} : vector<32x128xf32> to vector<16x32xf32>
    %cst_46 = arith.constant dense<0.000000e+00> : vector<16x16xf32>
    %149 = tpu.matmul %146, %147, %cst_46 {dimension_numbers = #tpu.dot_dimension_numbers<[1], [1], [0], [0], [0, 0, 1, 0], [], []>} : vector<16x32xf32>, vector<16x32xf32>, vector<16x16xf32> -> vector<16x16xf32>
    %150 = arith.addf %149, %32 : vector<16x16xf32>
    %cst_47 = arith.constant dense<0xFF800000> : vector<16xf32>
    %151 = vector.multi_reduction <maximumf>, %150, %cst_47 [1] : vector<16x16xf32> to vector<16xf32>
    %152 = vector.shape_cast %151 : vector<16xf32> to vector<16x1xf32>
    %153 = vector.broadcast %152 : vector<16x1xf32> to vector<16x16xf32>
    %154 = arith.subf %150, %153 : vector<16x16xf32>
    %155 = math.exp %154 : vector<16x16xf32>
    %cst_48 = arith.constant dense<0.000000e+00> : vector<16xf32>
    %156 = vector.multi_reduction <add>, %155, %cst_48 [1] : vector<16x16xf32> to vector<16xf32>
    %157 = vector.shape_cast %156 : vector<16xf32> to vector<16x1xf32>
    %158 = tpu.reciprocal %157 : vector<16x1xf32> -> vector<16x1xf32>
    %159 = vector.broadcast %158 : vector<16x1xf32> to vector<16x16xf32>
    %160 = arith.mulf %155, %159 : vector<16x16xf32>
    %cst_49 = arith.constant dense<0.000000e+00> : vector<16x32xf32>
    %161 = tpu.matmul %160, %148, %cst_49 {dimension_numbers = #tpu.dot_dimension_numbers<[1], [0], [0], [1], [0, 0, 1, 1], [], []>} : vector<16x16xf32>, vector<16x32xf32>, vector<16x32xf32> -> vector<16x32xf32>
    %162 = tpu.concatenate %113, %129, %145, %161 in 1 : vector<16x32xf32>, vector<16x32xf32>, vector<16x32xf32>, vector<16x32xf32> -> vector<16x128xf32>
    %163 = tpu.concatenate %97, %162 in 0 : vector<16x128xf32>, vector<16x128xf32> -> vector<32x128xf32>
    %164 = arith.truncf %163 : vector<32x128xf32> to vector<32x128xbf16>
    %c0_50 = arith.constant 0 : index
    %c0_51 = arith.constant 0 : index
    %165 = vector.load %arg9[%c0_50, %c0_51] : memref<128x128xbf16, #tpu.memory_space<vmem>>, vector<128x128xbf16>
    %cst_52 = arith.constant dense<0.000000e+00> : vector<32x128xf32>
    %166 = tpu.matmul %164, %165, %cst_52 {dimension_numbers = #tpu.dot_dimension_numbers<[1], [0], [0], [1], [0, 0, 1, 1], [], []>} : vector<32x128xbf16>, vector<128x128xbf16>, vector<32x128xf32> -> vector<32x128xf32>
    %167 = arith.addf %0, %166 : vector<32x128xf32>
    %168 = arith.mulf %167, %167 : vector<32x128xf32>
    %cst_53 = arith.constant dense<0.000000e+00> : vector<32xf32>
    %169 = vector.multi_reduction <add>, %168, %cst_53 [1] : vector<32x128xf32> to vector<32xf32>
    %170 = vector.shape_cast %169 : vector<32xf32> to vector<32x1xf32>
    %cst_54 = arith.constant 1.280000e+02 : f32
    %171 = vector.broadcast %cst_54 : f32 to vector<32x1xf32>
    %172 = arith.divf %170, %171 : vector<32x1xf32>
    %cst_55 = arith.constant 9.99999997E-7 : f32
    %173 = vector.broadcast %cst_55 : f32 to vector<32x1xf32>
    %174 = arith.addf %172, %173 : vector<32x1xf32>
    %175 = math.rsqrt %174 : vector<32x1xf32>
    %176 = vector.broadcast %175 : vector<32x1xf32> to vector<32x128xf32>
    %177 = arith.mulf %167, %176 : vector<32x128xf32>
    %c0_56 = arith.constant 0 : index
    %c0_57 = arith.constant 0 : index
    %178 = vector.load %arg10[%c0_56, %c0_57] : memref<1x128xf32, #tpu.memory_space<vmem>>, vector<1x128xf32>
    %179 = vector.broadcast %178 : vector<1x128xf32> to vector<32x128xf32>
    %180 = arith.mulf %177, %179 : vector<32x128xf32>
    %181 = arith.truncf %180 : vector<32x128xf32> to vector<32x128xbf16>
    %c0_58 = arith.constant 0 : index
    %c0_59 = arith.constant 0 : index
    %182 = vector.load %arg11[%c0_58, %c0_59] : memref<128x512xbf16, #tpu.memory_space<vmem>>, vector<128x512xbf16>
    %cst_60 = arith.constant dense<0.000000e+00> : vector<32x512xf32>
    %183 = tpu.matmul %181, %182, %cst_60 {dimension_numbers = #tpu.dot_dimension_numbers<[1], [0], [0], [1], [0, 0, 1, 1], [], []>} : vector<32x128xbf16>, vector<128x512xbf16>, vector<32x512xf32> -> vector<32x512xf32>
    %184 = vector.extract_strided_slice %183 {offsets = [0, 0], sizes = [32, 256], strides = [1, 1]} : vector<32x512xf32> to vector<32x256xf32>
    %185 = vector.extract_strided_slice %183 {offsets = [0, 256], sizes = [32, 256], strides = [1, 1]} : vector<32x512xf32> to vector<32x256xf32>
    %186 = arith.negf %184 : vector<32x256xf32>
    %187 = math.exp %186 : vector<32x256xf32>
    %cst_61 = arith.constant 1.000000e+00 : f32
    %188 = vector.broadcast %cst_61 : f32 to vector<32x256xf32>
    %189 = arith.addf %188, %187 : vector<32x256xf32>
    %190 = arith.divf %188, %189 : vector<32x256xf32>
    %191 = arith.mulf %184, %190 : vector<32x256xf32>
    %192 = arith.mulf %191, %185 : vector<32x256xf32>
    %193 = arith.truncf %192 : vector<32x256xf32> to vector<32x256xbf16>
    %c0_62 = arith.constant 0 : index
    %c0_63 = arith.constant 0 : index
    %194 = vector.load %arg12[%c0_62, %c0_63] : memref<256x128xbf16, #tpu.memory_space<vmem>>, vector<256x128xbf16>
    %cst_64 = arith.constant dense<0.000000e+00> : vector<32x128xf32>
    %195 = tpu.matmul %193, %194, %cst_64 {dimension_numbers = #tpu.dot_dimension_numbers<[1], [0], [0], [1], [0, 0, 1, 1], [], []>} : vector<32x256xbf16>, vector<256x128xbf16>, vector<32x128xf32> -> vector<32x128xf32>
    %196 = arith.addf %167, %195 : vector<32x128xf32>
    %c0_65 = arith.constant 0 : index
    %c0_66 = arith.constant 0 : index
    %197 = vector.load %arg13[%c0_65, %c0_66] : memref<32x128xf32, #tpu.memory_space<vmem>>, vector<32x128xf32>
    tpu.vector_store %arg13[%c0_65, %c0_66], %196 {strides = array<i32>} : memref<32x128xf32, #tpu.memory_space<vmem>>, vector<32x128xf32>,
    return
  }
  func.func @transform_0(%arg0: i32) -> (i32, i32) {
    %c0_i32 = arith.constant 0 : i32
    %c0_i32_0 = arith.constant 0 : i32
    %c0_i32_1 = arith.constant 0 : i32
    return %c0_i32, %c0_i32_0 : i32, i32
  }
  func.func @transform_1(%arg0: i32) -> (i32, i32) {
    %c0_i32 = arith.constant 0 : i32
    %c0_i32_0 = arith.constant 0 : i32
    %c0_i32_1 = arith.constant 0 : i32
    return %c0_i32, %c0_i32_0 : i32, i32
  }
  func.func @transform_2(%arg0: i32) -> (i32, i32) {
    %c0_i32 = arith.constant 0 : i32
    %c0_i32_0 = arith.constant 0 : i32
    %c0_i32_1 = arith.constant 0 : i32
    return %c0_i32, %c0_i32_0 : i32, i32
  }
  func.func @transform_3(%arg0: i32) -> (i32, i32) {
    %c0_i32 = arith.constant 0 : i32
    %c0_i32_0 = arith.constant 0 : i32
    %c0_i32_1 = arith.constant 0 : i32
    return %c0_i32, %c0_i32_0 : i32, i32
  }
  func.func @transform_4(%arg0: i32) -> (i32, i32) {
    %c0_i32 = arith.constant 0 : i32
    %c0_i32_0 = arith.constant 0 : i32
    %c0_i32_1 = arith.constant 0 : i32
    return %c0_i32, %c0_i32_0 : i32, i32
  }
  func.func @transform_5(%arg0: i32) -> (i32, i32) {
    %c0_i32 = arith.constant 0 : i32
    %c0_i32_0 = arith.constant 0 : i32
    %c0_i32_1 = arith.constant 0 : i32
    return %c0_i32, %c0_i32_0 : i32, i32
  }
  func.func @transform_6(%arg0: i32) -> (i32, i32) {
    %c0_i32 = arith.constant 0 : i32
    %c0_i32_0 = arith.constant 0 : i32
    %c0_i32_1 = arith.constant 0 : i32
    return %c0_i32, %c0_i32_0 : i32, i32
  }
  func.func @transform_7(%arg0: i32) -> (i32, i32) {
    %c0_i32 = arith.constant 0 : i32
    %c0_i32_0 = arith.constant 0 : i32
    %c0_i32_1 = arith.constant 0 : i32
    return %c0_i32, %c0_i32_0 : i32, i32
  }
  func.func @transform_8(%arg0: i32) -> (i32, i32) {
    %c0_i32 = arith.constant 0 : i32
    %c0_i32_0 = arith.constant 0 : i32
    %c0_i32_1 = arith.constant 0 : i32
    return %c0_i32, %c0_i32_0 : i32, i32
  }
  func.func @transform_9(%arg0: i32) -> (i32, i32) {
    %c0_i32 = arith.constant 0 : i32
    %c0_i32_0 = arith.constant 0 : i32
    %c0_i32_1 = arith.constant 0 : i32
    return %c0_i32, %c0_i32_0 : i32, i32
  }
  func.func @transform_10(%arg0: i32) -> (i32, i32) {
    %c0_i32 = arith.constant 0 : i32
    %c0_i32_0 = arith.constant 0 : i32
    %c0_i32_1 = arith.constant 0 : i32
    return %c0_i32, %c0_i32_0 : i32, i32
  }
  func.func @transform_11(%arg0: i32) -> (i32, i32) {
    %c0_i32 = arith.constant 0 : i32
    %c0_i32_0 = arith.constant 0 : i32
    %c0_i32_1 = arith.constant 0 : i32
    return %c0_i32, %c0_i32_0 : i32, i32
  }
  func.func @transform_12(%arg0: i32) -> (i32, i32) {
    %c0_i32 = arith.constant 0 : i32
    %c0_i32_0 = arith.constant 0 : i32
    %c0_i32_1 = arith.constant 0 : i32
    return %c0_i32, %c0_i32_0 : i32, i32
  }
}

</mosaic_0001>

<bundles_post_ra>
// kernel: vlm_decoder_forward.1
= control target key start
LH: loop header
LB: loop body
LE: loop exit
PB: predicated region body
PF: predicated region fallthrough
CT: control target
= control target key end

     0   :  { %17 = vsyncpa [#allocation3], 0  ;;  %s4699_s0 = inlined_call_operand.hbm [shape: f32[32,128], index: 0, kind: input, shape index: {}]   ;;  %s4700_s1 = inlined_call_operand.vmem [shape: f32[16,16], index: 1, kind: input, shape index: {}]   ;;  %s4701_s2 = inlined_call_operand.vmem [shape: f32[1,128], index: 2, kind: input, shape index: {}]   ;;  %s4702_s3 = inlined_call_operand.hbm [shape: bf16[128,640], index: 3, kind: input, shape index: {}]   ;;  %s4703_s4 = inlined_call_operand.hbm [shape: f32[32,128], index: 4, kind: input, shape index: {}]   ;;  %s4704_s5 = inlined_call_operand.hbm [shape: f32[32,128], index: 5, kind: input, shape index: {}]   ;;  %s4705_s6 = inlined_call_operand.hbm [shape: f32[32,128], index: 6, kind: input, shape index: {}]   ;;  %s4706_s7 = inlined_call_operand.hbm [shape: f32[32,128], index: 7, kind: input, shape index: {}]   ;;  %s4707_s8 = inlined_call_operand.hbm [shape: bf16[128,128], index: 8, kind: input, shape index: {}]   ;;  %s4708_s9 = inlined_call_operand.vmem [shape: f32[1,128], index: 9, kind: input, shape index: {}]   ;;  %s4709_s10 = inlined_call_operand.hbm [shape: bf16[128,512], index: 10, kind: input, shape index: {}]   ;;  %s4710_s11 = inlined_call_operand.hbm [shape: bf16[256,128], index: 11, kind: input, shape index: {}]   ;;  %s4711_s12 = inlined_call_operand.hbm [shape: f32[32,128], index: 12, kind: output, shape index: {}]  }
   0x1   :  { %18 = vsyncpa [#allocation6], 0 }
   0x2   :  { %19 = vsyncpa [#allocation9], 0 }
   0x3   :  { %20 = vsyncpa [#allocation12], 0 }
   0x4   :  { %21 = vsyncpa [#allocation15], 0 }
   0x5   :  { %22 = vsyncpa [#allocation4], 0  ;;  %s4129_s21 = smov [#allocation5]   ;;  %s3897_s25 = scalar_lea.hbm %s4702_s3, 5120 }
   0x6   :  { %s44_s22 = sshll.u32 %s4129_s21, 4  ;;  %p3898_p0 = scmp.ne.s32.totalorder %s4702_s3, %s3897_s25  ;;  %s45_s22 = int_to_ptr.vmem [resolvable:$true] %s44_s22 }
   0x7   :  { %p3901_p1 = scmp.lt.u32.totalorder %s3897_s25, %s4702_s3 }
   0x9   :  { %p3903_p2 = pnand %p3901_p1, %p3898_p0 }
   0xb   :  { %3906 = shalt.err (!%p3903_p2)
}
   0xc   :  { %s3907_s30 = scalar_lea.vmem %s45_s22, 5120  ;;  %p3912_p4 = scmp.lt.s32.totalorder %s45_s22, %s45_s22 }
   0xd   :  { %p3908_p3 = scmp.ne.s32.totalorder %s45_s22, %s3907_s30  ;;  %p3913_p5 = scmp.lt.s32.totalorder %s3907_s30, %s3907_s30 }
   0xf   :  { %p3914_p6 = por %p3913_p5, %p3912_p4 }
  0x11   :  { %p3915_p7 = pnand %p3914_p6, %p3908_p3 }
  0x13   :  { %3918 = shalt.err (!%p3915_p7)
}
  0x14   :  { %s4130_s13 = smov 320   ;;  %s4131_s14 = smov 20  }
  0x15   :  { %50 = dma.hbm_to_vmem [thread:$0]  %s4702_s3, 5120, %s45_s22, [#allocation6], %s4130_s13, %s4130_s13, %s4131_s14  }
  0x16   :  { %s4132_s17 = smov [#allocation8]   ;;  %s4133_s19 = smov [#allocation11]  }
  0x17   :  { %s68_s18 = sshll.u32 %s4132_s17, 4  ;;  %s92_s20 = sshll.u32 %s4133_s19, 4  ;;  %s69_s18 = int_to_ptr.vmem [resolvable:$true] %s68_s18  ;;  %s93_s20 = int_to_ptr.vmem [resolvable:$true] %s92_s20 }
  0x18   :  { %s3919_s24 = scalar_lea.hbm %s4704_s5, 512 }
  0x19   :  { %p3920_p8 = scmp.ne.s32.totalorder %s4704_s5, %s3919_s24  ;;  %p3923_p9 = scmp.lt.u32.totalorder %s3919_s24, %s4704_s5 }
  0x1b   :  { %p3925_p10 = pnand %p3923_p9, %p3920_p8 }
  0x1d   :  { %3928 = shalt.err (!%p3925_p10)
}
  0x1e   :  { %s3929_s3 = scalar_lea.vmem %s69_s18, 512  ;;  %p3934_p12 = scmp.lt.s32.totalorder %s69_s18, %s69_s18 }
  0x1f   :  { %p3930_p11 = scmp.ne.s32.totalorder %s69_s18, %s3929_s3  ;;  %p3935_p13 = scmp.lt.s32.totalorder %s3929_s3, %s3929_s3 }
  0x21   :  { %p3936_p0 = por %p3935_p13, %p3934_p12 }
  0x23   :  { %p3937_p1 = pnand %p3936_p0, %p3930_p11 }
  0x25   :  { %3940 = shalt.err (!%p3937_p1)
}
  0x26   :  { %s4134_s22 = smov 128   ;;  %s4135_s29 = smov 8  }
  0x27   :  { %74 = dma.hbm_to_vmem [thread:$0]  %s4704_s5, 512, %s69_s18, [#allocation9], %s4134_s22, %s4134_s22, %s4135_s29  }
  0x28   :  { %s3941_s16 = scalar_lea.hbm %s4706_s7, 512 }
  0x29   :  { %p3942_p2 = scmp.ne.s32.totalorder %s4706_s7, %s3941_s16  ;;  %p3945_p3 = scmp.lt.u32.totalorder %s3941_s16, %s4706_s7 }
  0x2b   :  { %p3947_p4 = pnand %p3945_p3, %p3942_p2 }
  0x2d   :  { %3950 = shalt.err (!%p3947_p4)
}
  0x2e   :  { %s3951_s24 = scalar_lea.vmem %s93_s20, 512  ;;  %p3956_p6 = scmp.lt.s32.totalorder %s93_s20, %s93_s20 }
  0x2f   :  { %p3952_p5 = scmp.ne.s32.totalorder %s93_s20, %s3951_s24  ;;  %p3957_p7 = scmp.lt.s32.totalorder %s3951_s24, %s3951_s24 }
  0x31   :  { %p3958_p8 = por %p3957_p7, %p3956_p6 }
  0x33   :  { %p3959_p9 = pnand %p3958_p8, %p3952_p5 }
  0x35   :  { %3962 = shalt.err (!%p3959_p9)
}
  0x36   :  { %98 = dma.hbm_to_vmem [thread:$0]  %s4706_s7, 512, %s93_s20, [#allocation12], %s4134_s22, %s4134_s22, %s4135_s29  }
  0x37   :  { %s4136_s25 = smov [#allocation14]   ;;  %s3963_s3 = scalar_lea.hbm %s4709_s10, 4096 }
  0x38   :  { %s118_s26 = sshll.u32 %s4136_s25, 4  ;;  %p3964_p10 = scmp.ne.s32.totalorder %s4709_s10, %s3963_s3  ;;  %s119_s26 = int_to_ptr.vmem [resolvable:$true] %s118_s26 }
  0x39   :  { %p3967_p11 = scmp.lt.u32.totalorder %s3963_s3, %s4709_s10 }
  0x3b   :  { %p3969_p12 = pnand %p3967_p11, %p3964_p10 }
  0x3d   :  { %3972 = shalt.err (!%p3969_p12)
}
  0x3e   :  { %s3973_s16 = scalar_lea.vmem %s119_s26, 4096  ;;  %p3978_p0 = scmp.lt.s32.totalorder %s119_s26, %s119_s26 }
  0x3f   :  { %p3974_p13 = scmp.ne.s32.totalorder %s119_s26, %s3973_s16  ;;  %p3979_p1 = scmp.lt.s32.totalorder %s3973_s16, %s3973_s16 }
  0x41   :  { %p3980_p2 = por %p3979_p1, %p3978_p0 }
  0x43   :  { %p3981_p3 = pnand %p3980_p2, %p3974_p13 }
  0x45   :  { %3984 = shalt.err (!%p3981_p3)
}
  0x46   :  { %s4137_s7 = smov 256   ;;  %s4138_s20 = smov 16  }
  0x47   :  { %124 = dma.hbm_to_vmem [thread:$0]  %s4709_s10, 4096, %s119_s26, [#allocation15], %s4137_s7, %s4137_s7, %s4138_s20  }
  0x48   :  { %s4139_s21 = smov [#allocation2]   ;;  %s4140_s24 = smov [#allocation7]  }
  0x49   :  { %s28_s23 = sshll.u32 %s4139_s21, 4  ;;  %s56_s5 = sshll.u32 %s4140_s24, 4  ;;  %s29_s23 = int_to_ptr.vmem [resolvable:$true] %s28_s23  ;;  %s4269_s5 = int_to_ptr.vmem [resolvable:$true] %s56_s5 }
  0x4a   :  { %s3985_s27 = scalar_lea.hbm %s4699_s0, 512 }
  0x4b   :  { %p3986_p4 = scmp.ne.s32.totalorder %s4699_s0, %s3985_s27  ;;  %p3989_p5 = scmp.lt.u32.totalorder %s3985_s27, %s4699_s0 }
  0x4d   :  { %p3991_p6 = pnand %p3989_p5, %p3986_p4 }
  0x4f   :  { %3994 = shalt.err (!%p3991_p6)
}
  0x50   :  { %s3995_s10 = scalar_lea.vmem %s29_s23, 512  ;;  %p4000_p8 = scmp.lt.s32.totalorder %s29_s23, %s29_s23 }
  0x51   :  { %p3996_p7 = scmp.ne.s32.totalorder %s29_s23, %s3995_s10  ;;  %p4001_p9 = scmp.lt.s32.totalorder %s3995_s10, %s3995_s10 }
  0x53   :  { %p4002_p10 = por %p4001_p9, %p4000_p8 }
  0x55   :  { %p4003_p11 = pnand %p4002_p10, %p3996_p7 }
  0x57   :  { %4006 = shalt.err (!%p4003_p11)
}
  0x58   :  { %34 = dma.hbm_to_vmem [thread:$0]  %s4699_s0, 512, %s29_s23, [#allocation3], %s4134_s22, %s4134_s22, %s4135_s29  }
  0x59   :  { %s4007_s7 = scalar_lea.hbm %s4703_s4, 512 }
  0x5a   :  { %p4008_p12 = scmp.ne.s32.totalorder %s4703_s4, %s4007_s7  ;;  %p4011_p13 = scmp.lt.u32.totalorder %s4007_s7, %s4703_s4 }
  0x5c   :  { %p4013_p0 = pnand %p4011_p13, %p4008_p12 }
  0x5e   :  { %4016 = shalt.err (!%p4013_p0)
}
  0x5f   :  { %s4017_s24 = scalar_lea.vmem %s4269_s5, 512  ;;  %p4022_p2 = scmp.lt.s32.totalorder %s4269_s5, %s4269_s5 }
  0x60   :  { %p4018_p1 = scmp.ne.s32.totalorder %s4269_s5, %s4017_s24  ;;  %p4023_p3 = scmp.lt.s32.totalorder %s4017_s24, %s4017_s24 }
  0x62   :  { %p4024_p4 = por %p4023_p3, %p4022_p2 }
  0x64   :  { %p4025_p5 = pnand %p4024_p4, %p4018_p1 }
  0x66   :  { %4028 = shalt.err (!%p4025_p5)
}
  0x67   :  { %62 = dma.hbm_to_vmem [thread:$0]  %s4703_s4, 512, %s4269_s5, [#allocation6], %s4134_s22, %s4134_s22, %s4135_s29  }
  0x68   :  { %s4141_s18 = smov [#allocation10]   ;;  %s4142_s27 = smov [#allocation13]  }
  0x69   :  { %s80_s25 = sshll.u32 %s4141_s18, 4  ;;  %s104_s28 = sshll.u32 %s4142_s27, 4  ;;  %s81_s25 = int_to_ptr.vmem [resolvable:$true] %s80_s25  ;;  %s4306_s28 = int_to_ptr.vmem [resolvable:$true] %s104_s28 }
  0x6a   :  { %s4029_s13 = scalar_lea.hbm %s4705_s6, 512 }
  0x6b   :  { %p4030_p6 = scmp.ne.s32.totalorder %s4705_s6, %s4029_s13  ;;  %p4033_p7 = scmp.lt.u32.totalorder %s4029_s13, %s4705_s6 }
  0x6d   :  { %p4035_p8 = pnand %p4033_p7, %p4030_p6 }
  0x6f   :  { %4038 = shalt.err (!%p4035_p8)
}
  0x70   :  { %s4039_s4 = scalar_lea.vmem %s81_s25, 512  ;;  %p4044_p10 = scmp.lt.s32.totalorder %s81_s25, %s81_s25 }
  0x71   :  { %p4040_p9 = scmp.ne.s32.totalorder %s81_s25, %s4039_s4  ;;  %p4045_p11 = scmp.lt.s32.totalorder %s4039_s4, %s4039_s4 }
  0x73   :  { %p4046_p12 = por %p4045_p11, %p4044_p10 }
  0x75   :  { %p4047_p13 = pnand %p4046_p12, %p4040_p9 }
  0x77   :  { %4050 = shalt.err (!%p4047_p13)
}
  0x78   :  { %86 = dma.hbm_to_vmem [thread:$0]  %s4705_s6, 512, %s81_s25, [#allocation9], %s4134_s22, %s4134_s22, %s4135_s29  }
  0x79   :  { %s4051_s17 = scalar_lea.hbm %s4707_s8, 1024 }
  0x7a   :  { %p4052_p0 = scmp.ne.s32.totalorder %s4707_s8, %s4051_s17  ;;  %p4055_p1 = scmp.lt.u32.totalorder %s4051_s17, %s4707_s8 }
  0x7c   :  { %p4057_p2 = pnand %p4055_p1, %p4052_p0 }
  0x7e   :  { %4060 = shalt.err (!%p4057_p2)
}
  0x7f   :  { %s4061_s23 = scalar_lea.vmem %s4306_s28, 1024  ;;  %p4066_p4 = scmp.lt.s32.totalorder %s4306_s28, %s4306_s28 }
  0x80   :  { %p4062_p3 = scmp.ne.s32.totalorder %s4306_s28, %s4061_s23  ;;  %p4067_p5 = scmp.lt.s32.totalorder %s4061_s23, %s4061_s23 }
  0x82   :  { %p4068_p6 = por %p4067_p5, %p4066_p4 }
  0x84   :  { %p4069_p7 = pnand %p4068_p6, %p4062_p3 }
  0x86   :  { %4072 = shalt.err (!%p4069_p7)
}
  0x87   :  { %s4143_s6 = smov 64   ;;  %s4144_s18 = smov 4  }
  0x88   :  { %110 = dma.hbm_to_vmem [thread:$0]  %s4707_s8, 1024, %s4306_s28, [#allocation12], %s4143_s6, %s4143_s6, %s4144_s18  }
  0x89   :  { %s4145_s3 = smov [#allocation16]   ;;  %s4073_s26 = scalar_lea.hbm %s4710_s11, 2048 }
  0x8a   :  { %s130_s30 = sshll.u32 %s4145_s3, 4  ;;  %p4074_p8 = scmp.ne.s32.totalorder %s4710_s11, %s4073_s26  ;;  %s131_s30 = int_to_ptr.vmem [resolvable:$true] %s130_s30 }
  0x8b   :  { %p4077_p9 = scmp.lt.u32.totalorder %s4073_s26, %s4710_s11 }
  0x8d   :  { %p4079_p10 = pnand %p4077_p9, %p4074_p8 }
  0x8f   :  { %4082 = shalt.err (!%p4079_p10)
}
  0x90   :  { %s4083_s16 = scalar_lea.vmem %s131_s30, 2048  ;;  %p4088_p12 = scmp.lt.s32.totalorder %s131_s30, %s131_s30 }
  0x91   :  { %p4084_p11 = scmp.ne.s32.totalorder %s131_s30, %s4083_s16  ;;  %p4089_p13 = scmp.lt.s32.totalorder %s4083_s16, %s4083_s16 }
  0x93   :  { %p4090_p0 = por %p4089_p13, %p4088_p12 }
  0x95   :  { %p4091_p1 = pnand %p4090_p0, %p4084_p11 }
  0x97   :  { %4094 = shalt.err (!%p4091_p1)
}
  0x98   :  { %136 = dma.hbm_to_vmem [thread:$0]  %s4710_s11, 2048, %s131_s30, [#allocation15], %s4143_s6, %s4143_s6, %s4144_s18  }
  0x99   :  { %4117 = dma.done.wait [#allocation3], 512  }
  0x9a   :  { %4118 = vsyncadd [#allocation3], 4294966784 }
  0x9b   :  { %4119 = dma.done.wait [#allocation6], 5632  }
  0x9c   :  { %4120 = vsyncadd [#allocation6], 4294961664 }
  0x9d   :  { %4121 = dma.done.wait [#allocation9], 1024  }
  0x9e   :  { %4122 = vsyncadd [#allocation9], 4294966272 }
  0x9f   :  { %4123 = dma.done.wait [#allocation12], 1536  }
  0xa0   :  { %4124 = vsyncadd [#allocation12], 4294965760 }
  0xa1   :  { %4125 = dma.done.wait [#allocation15], 6144  }
  0xa2   :  { %4126 = vsyncadd [#allocation15], 4294961152  ;;  %v4356_v0 = vld [vmem:[#allocation2] sm:$0xff]  ;;  %v4358_v1 = vld [vmem:[#allocation2 + $0x8] sm:$0xff]  ;;  %v4146_v40 = vmov 0   ;;  %vm664_vm0 = vcmask 261120  }
  0xa3   :  { %v4360_v2 = vld [vmem:[#allocation2 + $0x10] sm:$0xff]  ;;  %v169_v3 = vmul.f32 %v4356_v0, %v4356_v0  ;;  %v4366_v5 = vld [vmem:[#allocation2 + $0x18] sm:$0xff]  ;;  %v170_v7 = vmul.f32 %v4358_v1, %v4358_v1  ;;  %v3655_v9 = vld [vmem:[#allocation5 + $0xc] ss:$20 sps:$4 sm:$0xff]   ;;  %499 = vmatprep.mubr.bf16.mxu0 %v4146_v40  ;;  %552 = vmatprep.mubr.bf16.mxu1 %v4146_v40  ;;  %vm752_vm2 = vcmask 130048   ;;  %s4148_s21 = smov 32  }
  0xa4   :  { %v171_v4 = vmul.f32 %v4360_v2, %v4360_v2  ;;  %v3653_v6 = vld [vmem:[#allocation5 + $0x4] ss:$20 sps:$4 sm:$0xff]   ;;  %v172_v8 = vmul.f32 %v4366_v5, %v4366_v5  ;;  %v3657_v10 = vld [vmem:[#allocation5] ss:$20 sps:$4 sm:$0xff]   ;;  %v3658_v11 = vld [vmem:[#allocation5 + $0x8] ss:$20 sps:$4 sm:$0xff]   ;;  %520 = vmatprep.subr.bf16.mxu1 %v3655_v9 }
  0xa5   :  { %173 = vadd.xlane.f32.xlu0 %v169_v3  ;;  %467 = vmatprep.subr.bf16.mxu0 %v3653_v6  ;;  %v3659_v12 = vld [vmem:[#allocation5 + $0x2c] ss:$20 sps:$4 sm:$0xff]   ;;  %v3661_v13 = vld [vmem:[#allocation5 + $0x34] ss:$20 sps:$4 sm:$0xff]   ;;  %v3664_v15 = vld [vmem:[#allocation5 + $0x30] ss:$20 sps:$4 sm:$0xff]  }
  0xa6   :  { %177 = vadd.xlane.f32.xlu1 %v171_v4  ;;  %468 = vmatpush1.bf16.msra.mxu0 %v3657_v10  ;;  %v3663_v14 = vld [vmem:[#allocation5 + $0x28] ss:$20 sps:$4 sm:$0xff]   ;;  %v3669_v18 = vld [vmem:[#allocation5 + $0x50] ss:$20 sps:$4 sm:$0xff]   ;;  %v3670_v19 = vld [vmem:[#allocation5 + $0x58] ss:$20 sps:$4 sm:$0xff]  }
  0xa7   :  { %521 = vmatpush1.bf16.msra.mxu1 %v3658_v11  ;;  %469 = vmatprep.subr.bf16.mxu0 %v3659_v12  ;;  %v3665_v16 = vld [vmem:[#allocation5 + $0x54] ss:$20 sps:$4 sm:$0xff]   ;;  %v3667_v17 = vld [vmem:[#allocation5 + $0x5c] ss:$20 sps:$4 sm:$0xff]   ;;  %v3673_v21 = vld [vmem:[#allocation5 + $0x84] ss:$20 sps:$4 sm:$0xff]  }
  0xa8   :  { %522 = vmatprep.subr.bf16.mxu1 %v3661_v13  ;;  %v3671_v20 = vld [vmem:[#allocation5 + $0x7c] ss:$20 sps:$4 sm:$0xff]   ;;  %v3675_v22 = vld [vmem:[#allocation5 + $0x78] ss:$20 sps:$4 sm:$0xff]   ;;  %v3676_v23 = vld [vmem:[#allocation5 + $0x80] ss:$20 sps:$4 sm:$0xff]  }
  0xa9   :  { %175 = vadd.xlane.f32.xlu0 %v170_v7  ;;  %v3677_v24 = vld [vmem:[#allocation5 + $0xa4] ss:$20 sps:$4 sm:$0xff]   ;;  %v3679_v25 = vld [vmem:[#allocation5 + $0xac] ss:$20 sps:$4 sm:$0xff]   ;;  %v3682_v27 = vld [vmem:[#allocation5 + $0xa8] ss:$20 sps:$4 sm:$0xff]  }
  0xaa   :  { %179 = vadd.xlane.f32.xlu1 %v172_v8  ;;  %470 = vmatpush1.bf16.msra.mxu0 %v3663_v14  ;;  %v3681_v26 = vld [vmem:[#allocation5 + $0xa0] ss:$20 sps:$4 sm:$0xff]   ;;  %v3687_v30 = vld [vmem:[#allocation5 + $0xc8] ss:$20 sps:$4 sm:$0xff]   ;;  %v3688_v31 = vld [vmem:[#allocation5 + $0xd0] ss:$20 sps:$4 sm:$0xff]  }
  0xab   :  { %523 = vmatpush1.bf16.msra.mxu1 %v3664_v15  ;;  %471 = vmatprep.subr.bf16.mxu0 %v3665_v16  ;;  %v3683_v28 = vld [vmem:[#allocation5 + $0xcc] ss:$20 sps:$4 sm:$0xff]   ;;  %v3685_v29 = vld [vmem:[#allocation5 + $0xd4] ss:$20 sps:$4 sm:$0xff]   ;;  %v3691_v33 = vld [vmem:[#allocation5 + $0xfc] ss:$20 sps:$4 sm:$0xff]  }
  0xac   :  { %524 = vmatprep.subr.bf16.mxu1 %v3667_v17  ;;  %v3689_v32 = vld [vmem:[#allocation5 + $0xf4] ss:$20 sps:$4 sm:$0xff]   ;;  %v3693_v34 = vld [vmem:[#allocation5 + $0xf0] ss:$20 sps:$4 sm:$0xff]   ;;  %v3694_v35 = vld [vmem:[#allocation5 + $0xf8] ss:$20 sps:$4 sm:$0xff]  }
  0xad   :  { %v3695_v36 = vld [vmem:[#allocation5 + $0x11c] ss:$20 sps:$4 sm:$0xff]   ;;  %v3697_v37 = vld [vmem:[#allocation5 + $0x124] ss:$20 sps:$4 sm:$0xff]   ;;  %v3700_v39 = vld [vmem:[#allocation5 + $0x120] ss:$20 sps:$4 sm:$0xff]  }
  0xae   :  { %472 = vmatpush1.bf16.msra.mxu0 %v3669_v18  ;;  %v3699_v38 = vld [vmem:[#allocation5 + $0x118] ss:$20 sps:$4 sm:$0xff]   ;;  %v3701_v41 = vld [vmem:[#allocation5 + $0x10] ss:$20 sps:$4 sm:$0xff]   ;;  %v3044_v58 = vld [vmem:[%s4701_s2] ss:$0 sm:$0xff] }
  0xaf   :  { %525 = vmatpush1.bf16.msra.mxu1 %v3670_v19  ;;  %473 = vmatprep.subr.bf16.mxu0 %v3671_v20  ;;  %v3702_v6 = vld [vmem:[#allocation5 + $0x38] ss:$20 sps:$4 sm:$0xff]   ;;  %v3703_v8 = vld [vmem:[#allocation5 + $0x60] ss:$20 sps:$4 sm:$0xff]   ;;  %v3704_v9 = vld [vmem:[#allocation5 + $0x88] ss:$20 sps:$4 sm:$0xff]  }
  0xb0   :  { %526 = vmatprep.subr.bf16.mxu1 %v3673_v21  ;;  %v3707_v10 = vld [vmem:[#allocation5 + $0x100] ss:$20 sps:$4 sm:$0xff]   ;;  %v3708_v11 = vld [vmem:[#allocation5 + $0x128] ss:$20 sps:$4 sm:$0xff]   ;;  %vm4391_vm1 = vmpackc.low %vm664_vm0, %vm664_vm0  ;;  %vm1484_vm3 = vcmask 523264   ;;  %vm1487_vm4 = vcmask 785408  }
  0xb1   :  { %v622_v12 = vld [vmem:[#allocation7] sm:$0xff]  ;;  %v623_v18 = vld [vmem:[#allocation7 + $0x8] sm:$0xff] }
  0xb2   :  { %474 = vmatpush1.bf16.msra.mxu0 %v3675_v22  ;;  %v642_v13 = vld [vmem:[#allocation10] sm:$0xff]  ;;  %v643_v19 = vld [vmem:[#allocation10 + $0x8] sm:$0xff] }
  0xb3   :  { %527 = vmatpush1.bf16.msra.mxu1 %v3676_v23  ;;  %475 = vmatprep.subr.bf16.mxu0 %v3677_v24  ;;  %v630_v14 = vld [vmem:[#allocation8] sm:$0xff]  ;;  %v631_v24 = vld [vmem:[#allocation8 + $0x8] sm:$0xff] }
  0xb4   :  { %528 = vmatprep.subr.bf16.mxu1 %v3679_v25  ;;  %v650_v15 = vld [vmem:[#allocation11] sm:$0xff]  ;;  %v651_v25 = vld [vmem:[#allocation11 + $0x8] sm:$0xff] }
  0xb6   :  { %476 = vmatpush1.bf16.msra.mxu0 %v3681_v26 }
  0xb7   :  { %529 = vmatpush1.bf16.msra.mxu1 %v3682_v27  ;;  %477 = vmatprep.subr.bf16.mxu0 %v3683_v28 }
  0xb8   :  { %530 = vmatprep.subr.bf16.mxu1 %v3685_v29 }
  0xba   :  { %478 = vmatpush1.bf16.msra.mxu0 %v3687_v30 }
  0xbb   :  { %531 = vmatpush1.bf16.msra.mxu1 %v3688_v31  ;;  %479 = vmatprep.subr.bf16.mxu0 %v3689_v32 }
  0xbc   :  { %532 = vmatprep.subr.bf16.mxu1 %v3691_v33 }
  0xbe   :  { %480 = vmatpush1.bf16.msra.mxu0 %v3693_v34 }
  0xbf   :  { %533 = vmatpush1.bf16.msra.mxu1 %v3694_v35  ;;  %481 = vmatprep.subr.bf16.mxu0 %v3695_v36 }
  0xc0   :  { %534 = vmatprep.subr.bf16.mxu1 %v3697_v37 }
  0xc2   :  { %482 = vmatpush1.bf16.msra.mxu0 %v3699_v38 }
  0xc3   :  { %535 = vmatpush1.bf16.msra.mxu1 %v3700_v39  ;;  %3310 = vmatprep.subr.bf16.mxu0 %v3701_v41 }
 0x132   :  { %v174_v42 = vpop.xlane.xlu0 %173 }
 0x133   :  { %v178_v43 = vpop.xlane.xlu1 %177  ;;  %v182_v44 = vmul.f32 0.0078125, %v174_v42  ;;  %v644_v42 = vld [vmem:[#allocation10 + $0x10] sm:$0xff] }
 0x134   :  { %v184_v45 = vmul.f32 0.0078125, %v178_v43 }
 0x135   :  { %v186_v46 = vadd.f32 1e-06, %v182_v44  ;;  %v632_v44 = vld [vmem:[#allocation8 + $0x10] sm:$0xff] }
 0x136   :  { %v176_v47 = vpop.xlane.xlu0 %175  ;;  %v188_v48 = vadd.f32 1e-06, %v184_v45  ;;  %v652_v45 = vld [vmem:[#allocation11 + $0x10] sm:$0xff] }
 0x137   :  { %v180_v49 = vpop.xlane.xlu1 %179  ;;  %3781 = vrsqrt.f32 %v186_v46  ;;  %v183_v50 = vmul.f32 0.0078125, %v176_v47 }
 0x138   :  { %v185_v51 = vmul.f32 0.0078125, %v180_v49  ;;  %3783 = vrsqrt.f32 %v188_v48  ;;  %v625_v48 = vld [vmem:[#allocation7 + $0x18] sm:$0xff] }
 0x139   :  { %v187_v52 = vadd.f32 1e-06, %v183_v50  ;;  %v645_v50 = vld [vmem:[#allocation10 + $0x18] sm:$0xff] }
 0x13a   :  { %v189_v53 = vadd.f32 1e-06, %v185_v51 }
 0x13b   :  { %3785 = vrsqrt.f32 %v187_v52 }
 0x13c   :  { %3787 = vrsqrt.f32 %v189_v53 }
 0x141   :  { %v3782_v54 = vpop.eup %3781 }
 0x142   :  { %v3784_v55 = vpop.eup %3783  ;;  %v194_v56 = vmul.f32 %v3782_v54, %v4356_v0  ;;  %v633_v54 = vld [vmem:[#allocation8 + $0x18] sm:$0xff] }
 0x143   :  { %v196_v63 = vmul.f32 %v3784_v55, %v4360_v2  ;;  %v3705_v2 = vld [vmem:[#allocation5 + $0xb0] ss:$20 sps:$4 sm:$0xff]  }
 0x144   :  { %v205_v61 = vmul.f32 %v3044_v58, %v194_v56 }
 0x145   :  { %v3786_v57 = vpop.eup %3785  ;;  %v207_v7 = vmul.f32 %v3044_v58, %v196_v63 }
 0x146   :  { %v3788_v59 = vpop.eup %3787  ;;  %v195_v60 = vmul.f32 %v3786_v57, %v4358_v1  ;;  %v653_v57 = vld [vmem:[#allocation11 + $0x18] sm:$0xff] }
 0x147   :  { %v197_v3 = vmul.f32 %v3788_v59, %v4366_v5  ;;  %v3706_v5 = vld [vmem:[#allocation5 + $0xd8] ss:$20 sps:$4 sm:$0xff]  }
 0x148   :  { %v206_v62 = vmul.f32 %v3044_v58, %v195_v60 }
 0x149   :  { %v208_v0 = vmul.f32 %v3044_v58, %v197_v3 }
 0x14a   :  { %v209_v4 = vpack.c.bf16 %v206_v62, %v205_v61 }
 0x14b   :  { %v210_v1 = vpack.c.bf16 %v208_v0, %v207_v7 }
 0x14c   :  { %500 = vmatmul.mubr.bf16.vlgmr.msra.gmra.mrb[0].mxu0 %v209_v4  ;;  %553 = vmatmul.mubr.bf16.vlgmr.msra.gmra.mrb[0].mxu1 %v209_v4 }
 0x14d   :  { %509 = vmatprep.mubr.bf16.mxu0 %v4146_v40  ;;  %3311 = vmatpush3.bf16.msra.mxu0 %v3701_v41  ;;  %v624_v41 = vld [vmem:[#allocation7 + $0x10] sm:$0xff] }
 0x14e   :  { %3312 = vmatprep.subr.bf16.mxu0 %v3702_v6  ;;  %562 = vmatprep.mubr.bf16.mxu1 %v4146_v40 }
 0x151   :  { %3313 = vmatpush3.bf16.msra.mxu0 %v3702_v6 }
 0x152   :  { %3314 = vmatprep.subr.bf16.mxu0 %v3703_v8 }
 0x154   :  { %510 = vmatmul.mubr.bf16.gmra.mrb[4].mxu0 %v210_v1  ;;  %563 = vmatmul.mubr.bf16.gmra.mrb[4].mxu1 %v210_v1 }
 0x155   :  { %3326 = vmatprep.mubr.bf16.mxu0 %v209_v4  ;;  %3315 = vmatpush3.bf16.msra.mxu0 %v3703_v8 }
 0x156   :  { %3316 = vmatprep.subr.bf16.mxu0 %v3704_v9 }
 0x159   :  { %3317 = vmatpush3.bf16.msra.mxu0 %v3704_v9 }
 0x15a   :  { %3318 = vmatprep.subr.bf16.mxu0 %v3705_v2 }
 0x15d   :  { %3319 = vmatpush3.bf16.msra.mxu0 %v3705_v2 }
 0x15e   :  { %3320 = vmatprep.subr.bf16.mxu0 %v3706_v5 }
 0x161   :  { %3321 = vmatpush3.bf16.msra.mxu0 %v3706_v5 }
 0x162   :  { %3322 = vmatprep.subr.bf16.mxu0 %v3707_v10 }
 0x165   :  { %3323 = vmatpush3.bf16.msra.mxu0 %v3707_v10 }
 0x166   :  { %3324 = vmatprep.subr.bf16.mxu0 %v3708_v11 }
 0x169   :  { %3325 = vmatpush3.bf16.msra.mxu0 %v3708_v11 }
 0x16c   :  { %3327 = vmatmul.mubr.bf16.vlgmr.msra.gmra.mrb[8].mxu0 %v210_v1 }
 0x21f   :  { %v501_v16 = vpop.f32.mrb[0].mxu0  ;;  %v554_v17 = vpop.f32.mrb[0].mxu1 }
 0x220   :  { %v626_v20 = vmul.f32 %v622_v12, %v501_v16  ;;  %v646_v21 = vmul.f32 %v642_v13, %v554_v17  ;;  %v503_v22 = vpop.f32.mrb[1].mxu0  ;;  %v556_v23 = vpop.f32.mrb[1].mxu1 }
 0x221   :  { %v634_v26 = vmul.f32 %v630_v14, %v503_v22  ;;  %v654_v27 = vmul.f32 %v650_v15, %v556_v23  ;;  %v505_v28 = vpop.f32.mrb[2].mxu0  ;;  %v558_v29 = vpop.f32.mrb[2].mxu1 }
 0x222   :  { %v627_v30 = vmul.f32 %v623_v18, %v505_v28  ;;  %v647_v31 = vmul.f32 %v643_v19, %v558_v29  ;;  %v507_v32 = vpop.f32.mrb[3].mxu0  ;;  %v560_v33 = vpop.f32.mrb[3].mxu1  ;;  %v4420_v18 = vld [vmem:[%s4700_s1 + $0x8] sm:$0xff]  ;;  %v4425_v19 = vld [vmem:[%s4700_s1] sm:$0xff]  ;;  %s4147_s1 = smov 96  }
 0x223   :  { %v4383_v34 = vadd.f32 %v634_v26, %v626_v20  ;;  %v658_v35 = vadd.f32 %v654_v27, %v646_v21  ;;  %v635_v36 = vmul.f32 %v631_v24, %v507_v32  ;;  %v655_v37 = vmul.f32 %v651_v25, %v560_v33 }
 0x225   :  { %v4385_v38 = vadd.f32 %v635_v36, %v627_v30  ;;  %v659_v39 = vadd.f32 %v655_v37, %v647_v31  ;;  %3334 = vmatprep.mubr.msk.f32.mxu1 %vm664_vm0, %v4383_v34 }
 0x227   :  { %v3462_v46 = vpack.c.bf16 %v659_v39, %v658_v35  ;;  %v511_v47 = vpop.f32.mrb[4].mxu0  ;;  %v564_v49 = vpop.f32.mrb[4].mxu1  ;;  %v4395_v51 = vpack.i.bf16 %v659_v39, %v658_v35 }
 0x228   :  { %v628_v52 = vmul.f32 %v624_v41, %v511_v47  ;;  %v513_v53 = vpop.f32.mrb[5].mxu0  ;;  %v648_v55 = vmul.f32 %v644_v42, %v564_v49  ;;  %v566_v56 = vpop.f32.mrb[5].mxu1 }
 0x229   :  { %3464 = vmatprep.subr.msk.bf16.mxu1 %vm4391_vm1, %v3462_v46  ;;  %v636_v58 = vmul.f32 %v632_v44, %v513_v53  ;;  %v515_v59 = vpop.f32.mrb[6].mxu0  ;;  %v656_v60 = vmul.f32 %v652_v45, %v566_v56  ;;  %v568_v61 = vpop.f32.mrb[6].mxu1 }
 0x22a   :  { %3467 = vmatpush3.bf16.xpose.msk.msra.mxu1 %vm4391_vm1, %v3462_v46  ;;  %v629_v62 = vmul.f32 %v625_v48, %v515_v59  ;;  %v517_v63 = vpop.f32.mrb[7].mxu0  ;;  %v649_v3 = vmul.f32 %v645_v50, %v568_v61  ;;  %v570_v4 = vpop.f32.mrb[7].mxu1 }
 0x22b   :  { %v4401_v6 = vadd.f32 %v636_v58, %v628_v52  ;;  %v637_v7 = vmul.f32 %v633_v54, %v517_v63  ;;  %v660_v0 = vadd.f32 %v656_v60, %v648_v55  ;;  %v657_v8 = vmul.f32 %v653_v57, %v570_v4 }
 0x22d   :  { %v4403_v1 = vadd.f32 %v637_v7, %v629_v62  ;;  %v661_v9 = vadd.f32 %v657_v8, %v649_v3 }
 0x22f   :  { %v4413_v16 = vpack.i.bf16 %v661_v9, %v660_v0  ;;  %v4415_v17 = vpack.c.bf16 %v661_v9, %v660_v0 }
 0x231   :  { %3335 = vmatmul.mubr.msk.f32.vlgmr.msra.gmra.mrb[8].mxu1 %vm664_vm0, %v4385_v38 }
 0x23f   :  { %v3328_v2 = vpop.f32.mrb[8].mxu0 }
 0x240   :  { %v607_v5 = vpop.f32.mrb[9].mxu0 }
 0x241   :  { %v3329_v10 = vpop.f32.mrb[10].mxu0 }
 0x242   :  { %v610_v11 = vpop.f32.mrb[11].mxu0  ;;  %v4409_v14 = vpack.c.bf16 %v3329_v10, %v3328_v2  ;;  %v4411_v15 = vpack.i.bf16 %v3329_v10, %v3328_v2 }
 0x243   :  { %v3468_v12 = vpack.c.bf16 %v610_v11, %v607_v5  ;;  %v4407_v13 = vpack.i.bf16 %v610_v11, %v607_v5 }
 0x245   :  { %3469 = vmatprep.subr.bf16.mxu1 %v3468_v12 }
 0x246   :  { %3471 = vmatpush3.bf16.msra.mxu1 %v3468_v12 }
 0x304   :  { %v3336_v20 = vpop.f32.mrb[8].mxu1 }
 0x305   :  { %v749_v21 = vadd.f32 %v3336_v20, %v4420_v18  ;;  %v743_v22 = vpop.f32.mrb[9].mxu1 }
 0x306   :  { %v744_v23 = vadd.f32 %v743_v22, %v4425_v19 }
 0x307   :  { %v756_v24 = vsel %vm752_vm2, %v749_v21, -inf }
 0x308   :  { %757 = vmax.xlane.f32.xlu1 %v756_v24  ;;  %v753_v25 = vsel %vm752_vm2, %v744_v23, -inf }
 0x309   :  { %754 = vmax.xlane.f32.xlu0 %v753_v25 }
 0x395   :  { %v758_v26 = vpop.xlane.xlu1 %757 }
 0x396   :  { %v760_v27 = vsub.f32 %v749_v21, %v758_v26  ;;  %v755_v28 = vpop.xlane.xlu0 %754 }
 0x397   :  { %v759_v29 = vsub.f32 %v744_v23, %v755_v28 }
 0x398   :  { %v763_v30 = vmul.f32 1.442695, %v760_v27 }
 0x399   :  { %v761_v31 = vmul.f32 1.442695, %v759_v29 }
 0x39a   :  { %3789 = vpow2.f32 %v763_v30 }
 0x39b   :  { %3791 = vpow2.f32 %v761_v31 }
 0x3a4   :  { %v3790_v32 = vpop.eup %3789 }
 0x3a5   :  { %v3792_v33 = vpop.eup %3791  ;;  %v768_v35 = vsel %vm752_vm2, %v3790_v32, 0.0 }
 0x3a6   :  { %769 = vadd.xlane.f32.xlu1 %v768_v35  ;;  %v765_v36 = vsel %vm752_vm2, %v3792_v33, 0.0 }
 0x3a7   :  { %766 = vadd.xlane.f32.xlu0 %v765_v36 }
 0x3b7   :  { %856 = vrot.lane.b32.xlu1 %v4383_v34, %s4147_s1 }
 0x3bb   :  { %3569 = vrot.lane.b32.xlu1 %v4395_v51, %s4143_s6 }
 0x3bd   :  { %3564 = vrot.lane.b32.xlu0 %v4395_v51, %s4147_s1 }
 0x3bf   :  { %858 = vrot.lane.b32.xlu1 %v4385_v38, %s4147_s1 }
 0x3c1   :  { %1058 = vrot.lane.b32.xlu0 %v4383_v34, %s4143_s6 }
 0x3c3   :  { %1060 = vrot.lane.b32.xlu1 %v4385_v38, %s4143_s6 }
 0x433   :  { %v770_v37 = vpop.xlane.xlu1 %769 }
 0x434   :  { %3793 = vrcp.f32 %v770_v37  ;;  %v767_v39 = vpop.xlane.xlu0 %766 }
 0x435   :  { %3795 = vrcp.f32 %v767_v39 }
 0x437   :  { %v857_v41 = vpop.permute.xlu1 %856 }
 0x438   :  { %v3565_v42 = vpop.permute.xlu0 %3564 }
 0x439   :  { %v3567_v44 = vunpack.i.h.bf16 %v3565_v42  ;;  %v3566_v45 = vunpack.i.l.bf16 %v3565_v42 }
 0x43b   :  { %v3472_v46 = vpack.c.bf16 %v3567_v44, %v3566_v45  ;;  %v3570_v47 = vpop.permute.xlu1 %3569 }
 0x43c   :  { %v3572_v48 = vunpack.i.h.bf16 %v3570_v47  ;;  %v3571_v49 = vunpack.i.l.bf16 %v3570_v47  ;;  %v1059_v50 = vpop.permute.xlu0 %1058 }
 0x43d   :  { %3474 = vmatprep.subr.msk.bf16.mxu1 %vm4391_vm1, %v3472_v46  ;;  %3362 = vmatprep.mubr.msk.f32.mxu0 %vm664_vm0, %v1059_v50 }
 0x43e   :  { %v3794_v52 = vpop.eup %3793  ;;  %v3482_v53 = vpack.c.bf16 %v3572_v48, %v3571_v49 }
 0x43f   :  { %v3796_v54 = vpop.eup %3795  ;;  %v774_v56 = vmul.f32 %v3794_v52, %v3790_v32  ;;  %v859_v57 = vpop.permute.xlu1 %858 }
 0x440   :  { %3484 = vmatprep.subr.msk.bf16.mxu0 %vm4391_vm1, %v3482_v53  ;;  %v773_v55 = vmul.f32 %v3796_v54, %v3792_v33 }
 0x441   :  { %3487 = vmatpush3.bf16.xpose.msk.msra.mxu0 %vm4391_vm1, %v3482_v53 }
 0x442   :  { %3341 = vmatprep.mubr.msk.f32.mxu1 %vm752_vm2, %v773_v55 }
 0x443   :  { %3342 = vmatmul.mubr.msk.f32.vlgmr.msra.gmra.mrb[10].mxu1 %vm752_vm2, %v774_v56  ;;  %v1061_v58 = vpop.permute.xlu1 %1060 }
 0x444   :  { %3477 = vmatpush3.bf16.xpose.msk.msra.mxu1 %vm4391_vm1, %v3472_v46  ;;  %3348 = vmatprep.mubr.msk.f32.mxu1 %vm664_vm0, %v857_v41 }
 0x448   :  { %3363 = vmatmul.mubr.msk.f32.vlgmr.msra.gmra.mrb[12].mxu0 %vm664_vm0, %v1061_v58 }
 0x44b   :  { %3349 = vmatmul.mubr.msk.f32.vlgmr.msra.gmra.mrb[12].mxu1 %vm664_vm0, %v859_v57 }
 0x516   :  { %v4459_v59 = vpop.f32.mrb[10].mxu1 }
 0x517   :  { %v4461_v60 = vpop.f32.mrb[11].mxu1 }
 0x51b   :  { %v3364_v61 = vpop.f32.mrb[12].mxu0 }
 0x51c   :  { %v1140_v62 = vpop.f32.mrb[13].mxu0  ;;  %v1146_v2 = vadd.f32 %v3364_v61, %v4420_v18 }
 0x51d   :  { %v1141_v8 = vadd.f32 %v1140_v62, %v4425_v19 }
 0x51e   :  { %v3350_v63 = vpop.f32.mrb[12].mxu1  ;;  %v1152_v10 = vsel %vm752_vm2, %v1146_v2, -inf }
 0x51f   :  { %v944_v3 = vadd.f32 %v3350_v63, %v4420_v18  ;;  %v938_v4 = vpop.f32.mrb[13].mxu1  ;;  %v1149_v5 = vsel %vm752_vm2, %v1141_v8, -inf }
 0x520   :  { %v939_v7 = vadd.f32 %v938_v4, %v4425_v19 }
 0x521   :  { %v950_v0 = vsel %vm752_vm2, %v944_v3, -inf }
 0x522   :  { %951 = vmax.xlane.f32.xlu1 %v950_v0  ;;  %v947_v9 = vsel %vm752_vm2, %v939_v7, -inf }
 0x523   :  { %948 = vmax.xlane.f32.xlu0 %v947_v9 }
 0x527   :  { %1150 = vmax.xlane.f32.xlu0 %v1149_v5 }
 0x52b   :  { %1153 = vmax.xlane.f32.xlu0 %v1152_v10 }
 0x5af   :  { %v952_v20 = vpop.xlane.xlu1 %951 }
 0x5b0   :  { %v949_v11 = vpop.xlane.xlu0 %948  ;;  %v954_v23 = vsub.f32 %v944_v3, %v952_v20 }
 0x5b1   :  { %v953_v12 = vsub.f32 %v939_v7, %v949_v11 }
 0x5b2   :  { %v957_v28 = vmul.f32 1.442695, %v954_v23 }
 0x5b3   :  { %v955_v24 = vmul.f32 1.442695, %v953_v12 }
 0x5b4   :  { %v1151_v21 = vpop.xlane.xlu0 %1150 }
 0x5b5   :  { %v1155_v22 = vsub.f32 %v1141_v8, %v1151_v21 }
 0x5b7   :  { %v1157_v25 = vmul.f32 1.442695, %v1155_v22 }
 0x5b8   :  { %v1154_v26 = vpop.xlane.xlu0 %1153 }
 0x5b9   :  { %3797 = vpow2.f32 %v1157_v25  ;;  %v1156_v27 = vsub.f32 %v1146_v2, %v1154_v26 }
 0x5ba   :  { %3799 = vpow2.f32 %v955_v24 }
 0x5bb   :  { %v1159_v29 = vmul.f32 1.442695, %v1156_v27 }
 0x5bd   :  { %3801 = vpow2.f32 %v1159_v29 }
 0x5be   :  { %3803 = vpow2.f32 %v957_v28 }
 0x5c3   :  { %v3798_v30 = vpop.eup %3797 }
 0x5c4   :  { %v1161_v31 = vsel %vm752_vm2, %v3798_v30, 0.0  ;;  %v3800_v32 = vpop.eup %3799 }
 0x5c5   :  { %1162 = vadd.xlane.f32.xlu0 %v1161_v31  ;;  %v959_v35 = vsel %vm752_vm2, %v3800_v32, 0.0 }
 0x5c7   :  { %v3802_v33 = vpop.eup %3801 }
 0x5c8   :  { %v1164_v36 = vsel %vm752_vm2, %v3802_v33, 0.0  ;;  %v3804_v37 = vpop.eup %3803 }
 0x5c9   :  { %960 = vadd.xlane.f32.xlu0 %v959_v35  ;;  %1165 = vadd.xlane.f32.xlu1 %v1164_v36  ;;  %v962_v39 = vsel %vm752_vm2, %v3804_v37, 0.0 }
 0x5cd   :  { %963 = vadd.xlane.f32.xlu1 %v962_v39 }
 0x5de   :  { %3579 = vrot.lane.b32.xlu1 %v4407_v13, %s4143_s6 }
 0x5df   :  { %3574 = vrot.lane.b32.xlu0 %v4407_v13, %s4147_s1 }
 0x5e2   :  { %3584 = vrot.lane.b32.xlu1 %v4395_v51, %s4148_s21 }
 0x5e3   :  { %1260 = vrot.lane.b32.xlu0 %v4385_v38, %s4148_s21 }
 0x5e6   :  { %1258 = vrot.lane.b32.xlu1 %v4383_v34, %s4148_s21 }
 0x652   :  { %v1163_v41 = vpop.xlane.xlu0 %1162 }
 0x656   :  { %v1166_v42 = vpop.xlane.xlu1 %1165  ;;  %v961_v44 = vpop.xlane.xlu0 %960 }
 0x657   :  { %3805 = vrcp.f32 %v961_v44 }
 0x658   :  { %3807 = vrcp.f32 %v1163_v41 }
 0x65a   :  { %v964_v45 = vpop.xlane.xlu1 %963  ;;  %v3575_v46 = vpop.permute.xlu0 %3574 }
 0x65b   :  { %3809 = vrcp.f32 %v964_v45  ;;  %v3577_v47 = vunpack.i.h.bf16 %v3575_v46  ;;  %v3576_v48 = vunpack.i.l.bf16 %v3575_v46 }
 0x65c   :  { %3811 = vrcp.f32 %v1166_v42 }
 0x65d   :  { %v3478_v49 = vpack.c.bf16 %v3577_v47, %v3576_v48 }
 0x65e   :  { %v3580_v50 = vpop.permute.xlu1 %3579  ;;  %v1261_v0 = vpop.permute.xlu0 %1260 }
 0x65f   :  { %v3582_v51 = vunpack.i.h.bf16 %v3580_v50  ;;  %v3581_v52 = vunpack.i.l.bf16 %v3580_v50  ;;  %3479 = vmatprep.subr.bf16.mxu1 %v3478_v49 }
 0x660   :  { %3481 = vmatpush3.bf16.msra.mxu1 %v3478_v49 }
 0x661   :  { %v3488_v38 = vpack.c.bf16 %v3582_v51, %v3581_v52  ;;  %v3806_v53 = vpop.eup %3805 }
 0x662   :  { %v3585_v34 = vpop.permute.xlu1 %3584  ;;  %v967_v54 = vmul.f32 %v3806_v53, %v3800_v32  ;;  %v3808_v55 = vpop.eup %3807 }
 0x663   :  { %3489 = vmatprep.subr.bf16.mxu1 %v3488_v38  ;;  %v3587_v56 = vunpack.i.h.bf16 %v3585_v34  ;;  %v3586_v57 = vunpack.i.l.bf16 %v3585_v34  ;;  %v1169_v63 = vmul.f32 %v3808_v55, %v3798_v30 }
 0x664   :  { %3355 = vmatprep.mubr.msk.f32.mxu1 %vm752_vm2, %v967_v54 }
 0x665   :  { %v3810_v58 = vpop.eup %3809  ;;  %v3492_v3 = vpack.c.bf16 %v3587_v56, %v3586_v57 }
 0x666   :  { %v968_v61 = vmul.f32 %v3810_v58, %v3804_v37  ;;  %v3812_v62 = vpop.eup %3811  ;;  %v1259_v7 = vpop.permute.xlu1 %1258 }
 0x667   :  { %v1170_v4 = vmul.f32 %v3812_v62, %v3802_v33 }
 0x668   :  { %3356 = vmatmul.mubr.msk.f32.vlgmr.msra.gmra.mrb[14].mxu1 %vm752_vm2, %v968_v61 }
 0x669   :  { %3491 = vmatpush3.bf16.msra.mxu1 %v3488_v38  ;;  %3369 = vmatprep.mubr.msk.f32.mxu1 %vm752_vm2, %v1169_v63 }
 0x66a   :  { %3494 = vmatprep.subr.msk.bf16.mxu1 %vm4391_vm1, %v3492_v3 }
 0x66c   :  { %3370 = vmatmul.mubr.msk.f32.vlgmr.msra.gmra.mrb[16].mxu1 %vm752_vm2, %v1170_v4 }
 0x66d   :  { %3376 = vmatprep.mubr.msk.f32.mxu1 %vm664_vm0, %v1259_v7 }
 0x672   :  { %3497 = vmatpush3.bf16.xpose.msk.msra.mxu1 %vm4391_vm1, %v3492_v3 }
 0x673   :  { %3509 = vmatprep.subr.bf16.mxu1 %v4409_v14 }
 0x679   :  { %3377 = vmatmul.mubr.msk.f32.vlgmr.msra.gmra.mrb[18].mxu1 %vm664_vm0, %v1261_v0 }
 0x67a   :  { %3511 = vmatpush3.bf16.msra.mxu1 %v4409_v14 }
 0x73b   :  { %v4497_v8 = vpop.f32.mrb[14].mxu1 }
 0x73c   :  { %v4499_v9 = vpop.f32.mrb[15].mxu1 }
 0x73d   :  { %v3623_v2 = vpack.i.bf16 %v4497_v8, %v4499_v9 }
 0x73f   :  { %v4503_v5 = vpop.f32.mrb[16].mxu1 }
 0x740   :  { %v4505_v10 = vpop.f32.mrb[17].mxu1 }
 0x741   :  { %v3628_v11 = vpack.i.bf16 %v4503_v5, %v4505_v10 }
 0x74c   :  { %v3378_v12 = vpop.f32.mrb[18].mxu1 }
 0x74d   :  { %v1346_v20 = vadd.f32 %v3378_v12, %v4420_v18  ;;  %v1340_v21 = vpop.f32.mrb[19].mxu1 }
 0x74e   :  { %v1341_v14 = vadd.f32 %v1340_v21, %v4425_v19 }
 0x74f   :  { %v1352_v22 = vsel %vm752_vm2, %v1346_v20, -inf }
 0x750   :  { %1353 = vmax.xlane.f32.xlu0 %v1352_v22  ;;  %v1349_v23 = vsel %vm752_vm2, %v1341_v14, -inf }
 0x751   :  { %1350 = vmax.xlane.f32.xlu1 %v1349_v23 }
 0x762   :  { %3589 = vrot.lane.b32.xlu1 %v4407_v13, %s4148_s21 }
 0x766   :  { %3594 = vrot.lane.b32.xlu1 %v4413_v16, %s4147_s1 }
 0x76a   :  { %1682 = vrot.lane.b32.xlu1 %v4403_v1, %s4147_s1 }
 0x7dd   :  { %v1354_v24 = vpop.xlane.xlu0 %1353 }
 0x7de   :  { %v1356_v25 = vsub.f32 %v1346_v20, %v1354_v24  ;;  %v1351_v26 = vpop.xlane.xlu1 %1350 }
 0x7df   :  { %v1355_v27 = vsub.f32 %v1341_v14, %v1351_v26 }
 0x7e0   :  { %v1359_v28 = vmul.f32 1.442695, %v1356_v25 }
 0x7e1   :  { %v1357_v29 = vmul.f32 1.442695, %v1355_v27 }
 0x7e2   :  { %v3590_v30 = vpop.permute.xlu1 %3589 }
 0x7e3   :  { %3813 = vpow2.f32 %v1357_v29  ;;  %v3592_v31 = vunpack.i.h.bf16 %v3590_v30  ;;  %v3591_v32 = vunpack.i.l.bf16 %v3590_v30 }
 0x7e4   :  { %3815 = vpow2.f32 %v1359_v28 }
 0x7e5   :  { %v3498_v33 = vpack.c.bf16 %v3592_v31, %v3591_v32 }
 0x7e6   :  { %v3595_v35 = vpop.permute.xlu1 %3594 }
 0x7e7   :  { %v3597_v13 = vunpack.i.h.bf16 %v3595_v35  ;;  %v3596_v36 = vunpack.i.l.bf16 %v3595_v35  ;;  %3499 = vmatprep.subr.bf16.mxu0 %v3498_v33 }
 0x7e8   :  { %3501 = vmatpush3.bf16.msra.mxu0 %v3498_v33 }
 0x7e9   :  { %v3512_v37 = vpack.c.bf16 %v3597_v13, %v3596_v36  ;;  %3504 = vmatprep.subr.msk.bf16.mxu0 %vm4391_vm1, %v4415_v17 }
 0x7ea   :  { %v1683_v26 = vpop.permute.xlu1 %1682 }
 0x7eb   :  { %3514 = vmatprep.subr.msk.bf16.mxu1 %vm4391_vm1, %v3512_v37 }
 0x7ed   :  { %v3814_v39 = vpop.eup %3813 }
 0x7ee   :  { %v1361_v41 = vsel %vm752_vm2, %v3814_v39, 0.0  ;;  %v3816_v42 = vpop.eup %3815 }
 0x7ef   :  { %1362 = vadd.xlane.f32.xlu0 %v1361_v41  ;;  %v1364_v44 = vsel %vm752_vm2, %v3816_v42, 0.0 }
 0x7f3   :  { %1365 = vadd.xlane.f32.xlu0 %v1364_v44 }
 0x87c   :  { %v1363_v45 = vpop.xlane.xlu0 %1362 }
 0x87d   :  { %3817 = vrcp.f32 %v1363_v45 }
 0x880   :  { %v1366_v46 = vpop.xlane.xlu0 %1365 }
 0x881   :  { %3819 = vrcp.f32 %v1366_v46 }
 0x887   :  { %v3818_v47 = vpop.eup %3817 }
 0x888   :  { %v1369_v48 = vmul.f32 %v3818_v47, %v3814_v39 }
 0x88a   :  { %3383 = vmatprep.mubr.msk.f32.mxu0 %vm752_vm2, %v1369_v48 }
 0x88b   :  { %v3820_v49 = vpop.eup %3819 }
 0x88c   :  { %v1370_v50 = vmul.f32 %v3820_v49, %v3816_v42 }
 0x88e   :  { %3384 = vmatmul.mubr.msk.f32.vlgmr.msra.gmra.mrb[14].mxu0 %vm752_vm2, %v1370_v50 }
 0x88f   :  { %3507 = vmatpush3.bf16.xpose.msk.msra.mxu0 %vm4391_vm1, %v4415_v17  ;;  %3390 = vmatprep.mubr.msk.f32.mxu0 %vm664_vm0, %v4401_v6 }
 0x896   :  { %3391 = vmatmul.mubr.msk.f32.vlgmr.msra.gmra.mrb[16].mxu0 %vm664_vm0, %v4403_v1 }
 0x961   :  { %v4535_v51 = vpop.f32.mrb[14].mxu0 }
 0x962   :  { %v4537_v52 = vpop.f32.mrb[15].mxu0 }
 0x963   :  { %v3638_v38 = vpack.i.bf16 %v4535_v51, %v4537_v52 }
 0x969   :  { %v3392_v53 = vpop.f32.mrb[16].mxu0 }
 0x96a   :  { %v1568_v34 = vpop.f32.mrb[17].mxu0  ;;  %v1574_v55 = vadd.f32 %v3392_v53, %v4420_v18 }
 0x96b   :  { %v1569_v54 = vadd.f32 %v1568_v34, %v4425_v19 }
 0x96c   :  { %v1580_v56 = vsel %vm752_vm2, %v1574_v55, -inf }
 0x96d   :  { %v1577_v17 = vsel %vm752_vm2, %v1569_v54, -inf }
 0x96e   :  { %1578 = vmax.xlane.f32.xlu0 %v1577_v17 }
 0x972   :  { %1581 = vmax.xlane.f32.xlu0 %v1580_v56 }
 0x9fb   :  { %v1579_v57 = vpop.xlane.xlu0 %1578 }
 0x9fc   :  { %v1583_v58 = vsub.f32 %v1569_v54, %v1579_v57 }
 0x9fe   :  { %v1585_v61 = vmul.f32 1.442695, %v1583_v58 }
 0x9ff   :  { %v1582_v62 = vpop.xlane.xlu0 %1581 }
 0xa00   :  { %3821 = vpow2.f32 %v1585_v61  ;;  %v1584_v63 = vsub.f32 %v1574_v55, %v1582_v62 }
 0xa02   :  { %v1587_v3 = vmul.f32 1.442695, %v1584_v63 }
 0xa04   :  { %3823 = vpow2.f32 %v1587_v3 }
 0xa0a   :  { %v3822_v4 = vpop.eup %3821 }
 0xa0b   :  { %v1589_v7 = vsel %vm752_vm2, %v3822_v4, 0.0 }
 0xa0c   :  { %1590 = vadd.xlane.f32.xlu0 %v1589_v7 }
 0xa0e   :  { %v3824_v0 = vpop.eup %3823 }
 0xa0f   :  { %v1592_v12 = vsel %vm752_vm2, %v3824_v0, 0.0 }
 0xa10   :  { %1593 = vadd.xlane.f32.xlu0 %v1592_v12 }
 0xa26   :  { %1680 = vrot.lane.b32.xlu0 %v4401_v6, %s4147_s1 }
 0xa99   :  { %v1591_v20 = vpop.xlane.xlu0 %1590 }
 0xa9a   :  { %3825 = vrcp.f32 %v1591_v20 }
 0xa9d   :  { %v1594_v21 = vpop.xlane.xlu0 %1593 }
 0xa9e   :  { %3827 = vrcp.f32 %v1594_v21 }
 0xaa1   :  { %v1681_v25 = vpop.permute.xlu0 %1680 }
 0xaa4   :  { %v3826_v14 = vpop.eup %3825 }
 0xaa5   :  { %v1597_v22 = vmul.f32 %v3826_v14, %v3822_v4 }
 0xaa7   :  { %3397 = vmatprep.mubr.msk.f32.mxu1 %vm752_vm2, %v1597_v22 }
 0xaa8   :  { %v3828_v23 = vpop.eup %3827 }
 0xaa9   :  { %v1598_v24 = vmul.f32 %v3828_v23, %v3824_v0 }
 0xaab   :  { %3398 = vmatmul.mubr.msk.f32.vlgmr.msra.gmra.mrb[20].mxu1 %vm752_vm2, %v1598_v24 }
 0xaac   :  { %3517 = vmatpush3.bf16.xpose.msk.msra.mxu1 %vm4391_vm1, %v3512_v37  ;;  %3404 = vmatprep.mubr.msk.f32.mxu1 %vm664_vm0, %v1681_v25 }
 0xab3   :  { %3405 = vmatmul.mubr.msk.f32.vlgmr.msra.gmra.mrb[22].mxu1 %vm664_vm0, %v1683_v26 }
 0xb7e   :  { %v4555_v27 = vpop.f32.mrb[20].mxu1 }
 0xb7f   :  { %v4557_v28 = vpop.f32.mrb[21].mxu1 }
 0xb86   :  { %v3406_v29 = vpop.f32.mrb[22].mxu1 }
 0xb87   :  { %v1768_v30 = vadd.f32 %v3406_v29, %v4420_v18  ;;  %v1762_v31 = vpop.f32.mrb[23].mxu1 }
 0xb88   :  { %v1763_v32 = vadd.f32 %v1762_v31, %v4425_v19 }
 0xb89   :  { %v1774_v33 = vsel %vm752_vm2, %v1768_v30, -inf }
 0xb8a   :  { %1775 = vmax.xlane.f32.xlu0 %v1774_v33  ;;  %v1771_v35 = vsel %vm752_vm2, %v1763_v32, -inf }
 0xb8b   :  { %1772 = vmax.xlane.f32.xlu1 %v1771_v35 }
 0xb9c   :  { %3599 = vrot.lane.b32.xlu1 %v4411_v15, %s4147_s1 }
 0xba0   :  { %3604 = vrot.lane.b32.xlu0 %v4413_v16, %s4143_s6  ;;  %1882 = vrot.lane.b32.xlu1 %v4401_v6, %s4143_s6 }
 0xc17   :  { %v1776_v13 = vpop.xlane.xlu0 %1775 }
 0xc18   :  { %v1778_v36 = vsub.f32 %v1768_v30, %v1776_v13  ;;  %v1773_v37 = vpop.xlane.xlu1 %1772 }
 0xc19   :  { %v1777_v39 = vsub.f32 %v1763_v32, %v1773_v37 }
 0xc1a   :  { %v1781_v41 = vmul.f32 1.442695, %v1778_v36 }
 0xc1b   :  { %v1779_v42 = vmul.f32 1.442695, %v1777_v39  ;;  %v3605_v44 = vpop.permute.xlu0 %3604 }
 0xc1c   :  { %3829 = vpow2.f32 %v1781_v41  ;;  %v3600_v45 = vpop.permute.xlu1 %3599  ;;  %v3607_v46 = vunpack.i.h.bf16 %v3605_v44  ;;  %v3606_v47 = vunpack.i.l.bf16 %v3605_v44 }
 0xc1d   :  { %v3602_v48 = vunpack.i.h.bf16 %v3600_v45  ;;  %v3601_v49 = vunpack.i.l.bf16 %v3600_v45  ;;  %3831 = vpow2.f32 %v1779_v42 }
 0xc1e   :  { %v3522_v53 = vpack.c.bf16 %v3607_v46, %v3606_v47 }
 0xc1f   :  { %v3518_v50 = vpack.c.bf16 %v3602_v48, %v3601_v49 }
 0xc20   :  { %v1883_v56 = vpop.permute.xlu1 %1882 }
 0xc21   :  { %3519 = vmatprep.subr.bf16.mxu0 %v3518_v50 }
 0xc22   :  { %3521 = vmatpush3.bf16.msra.mxu0 %v3518_v50 }
 0xc23   :  { %3524 = vmatprep.subr.msk.bf16.mxu0 %vm4391_vm1, %v3522_v53 }
 0xc26   :  { %v3830_v34 = vpop.eup %3829 }
 0xc27   :  { %v1786_v54 = vsel %vm752_vm2, %v3830_v34, 0.0  ;;  %v3832_v55 = vpop.eup %3831 }
 0xc28   :  { %1787 = vadd.xlane.f32.xlu1 %v1786_v54  ;;  %v1783_v17 = vsel %vm752_vm2, %v3832_v55, 0.0 }
 0xc2c   :  { %1784 = vadd.xlane.f32.xlu1 %v1783_v17 }
 0xc3d   :  { %1884 = vrot.lane.b32.xlu1 %v4403_v1, %s4143_s6 }
 0xcb5   :  { %v1788_v57 = vpop.xlane.xlu1 %1787 }
 0xcb6   :  { %3833 = vrcp.f32 %v1788_v57 }
 0xcb9   :  { %v1785_v58 = vpop.xlane.xlu1 %1784 }
 0xcba   :  { %3835 = vrcp.f32 %v1785_v58 }
 0xcbd   :  { %v1885_v4 = vpop.permute.xlu1 %1884 }
 0xcc0   :  { %v3834_v61 = vpop.eup %3833 }
 0xcc1   :  { %v1792_v3 = vmul.f32 %v3834_v61, %v3830_v34 }
 0xcc4   :  { %v3836_v62 = vpop.eup %3835 }
 0xcc5   :  { %v1791_v63 = vmul.f32 %v3836_v62, %v3832_v55 }
 0xcc7   :  { %3411 = vmatprep.mubr.msk.f32.mxu0 %vm752_vm2, %v1791_v63 }
 0xcc8   :  { %3412 = vmatmul.mubr.msk.f32.vlgmr.msra.gmra.mrb[18].mxu0 %vm752_vm2, %v1792_v3 }
 0xcc9   :  { %3527 = vmatpush3.bf16.xpose.msk.msra.mxu0 %vm4391_vm1, %v3522_v53  ;;  %3418 = vmatprep.mubr.msk.f32.mxu0 %vm664_vm0, %v1883_v56 }
 0xcd0   :  { %3419 = vmatmul.mubr.msk.f32.vlgmr.msra.gmra.mrb[20].mxu0 %vm664_vm0, %v1885_v4 }
 0xd9b   :  { %v4581_v7 = vpop.f32.mrb[18].mxu0 }
 0xd9c   :  { %v4583_v0 = vpop.f32.mrb[19].mxu0 }
 0xd9d   :  { %v3633_v12 = vpack.i.bf16 %v4581_v7, %v4583_v0 }
 0xda3   :  { %v3420_v20 = vpop.f32.mrb[20].mxu0 }
 0xda4   :  { %v1970_v21 = vadd.f32 %v3420_v20, %v4420_v18  ;;  %v1964_v14 = vpop.f32.mrb[21].mxu0 }
 0xda5   :  { %v1965_v22 = vadd.f32 %v1964_v14, %v4425_v19 }
 0xda6   :  { %v1976_v23 = vsel %vm752_vm2, %v1970_v21, -inf }
 0xda7   :  { %1977 = vmax.xlane.f32.xlu0 %v1976_v23  ;;  %v1973_v24 = vsel %vm752_vm2, %v1965_v22, -inf }
 0xda8   :  { %1974 = vmax.xlane.f32.xlu1 %v1973_v24 }
 0xdb9   :  { %3609 = vrot.lane.b32.xlu1 %v4411_v15, %s4143_s6 }
 0xdbd   :  { %2082 = vrot.lane.b32.xlu1 %v4401_v6, %s4148_s21 }
 0xdc1   :  { %2084 = vrot.lane.b32.xlu1 %v4403_v1, %s4148_s21 }
 0xe34   :  { %v1978_v25 = vpop.xlane.xlu0 %1977 }
 0xe35   :  { %v1980_v26 = vsub.f32 %v1970_v21, %v1978_v25  ;;  %v1975_v29 = vpop.xlane.xlu1 %1974 }
 0xe36   :  { %v1979_v30 = vsub.f32 %v1965_v22, %v1975_v29 }
 0xe37   :  { %v1983_v31 = vmul.f32 1.442695, %v1980_v26 }
 0xe38   :  { %v1981_v32 = vmul.f32 1.442695, %v1979_v30 }
 0xe39   :  { %3837 = vpow2.f32 %v1983_v31  ;;  %v3610_v33 = vpop.permute.xlu1 %3609 }
 0xe3a   :  { %v3612_v35 = vunpack.i.h.bf16 %v3610_v33  ;;  %v3611_v13 = vunpack.i.l.bf16 %v3610_v33  ;;  %3839 = vpow2.f32 %v1981_v32 }
 0xe3c   :  { %v3528_v36 = vpack.c.bf16 %v3612_v35, %v3611_v13 }
 0xe3d   :  { %v2083_v34 = vpop.permute.xlu1 %2082 }
 0xe3e   :  { %3529 = vmatprep.subr.bf16.mxu1 %v3528_v36 }
 0xe3f   :  { %3531 = vmatpush3.bf16.msra.mxu1 %v3528_v36 }
 0xe43   :  { %v3838_v37 = vpop.eup %3837 }
 0xe44   :  { %v1988_v6 = vsel %vm752_vm2, %v3838_v37, 0.0  ;;  %v3840_v39 = vpop.eup %3839 }
 0xe45   :  { %1989 = vadd.xlane.f32.xlu0 %v1988_v6  ;;  %v1985_v1 = vsel %vm752_vm2, %v3840_v39, 0.0 }
 0xe49   :  { %1986 = vadd.xlane.f32.xlu0 %v1985_v1 }
 0xe5f   :  { %3614 = vrot.lane.b32.xlu0 %v4413_v16, %s4148_s21  ;;  %v2085_v16 = vpop.permute.xlu1 %2084 }
 0xed2   :  { %v1990_v41 = vpop.xlane.xlu0 %1989 }
 0xed3   :  { %3841 = vrcp.f32 %v1990_v41 }
 0xed6   :  { %v1987_v42 = vpop.xlane.xlu0 %1986 }
 0xed7   :  { %3843 = vrcp.f32 %v1987_v42 }
 0xeda   :  { %v3615_v44 = vpop.permute.xlu0 %3614 }
 0xedb   :  { %v3617_v45 = vunpack.i.h.bf16 %v3615_v44  ;;  %v3616_v46 = vunpack.i.l.bf16 %v3615_v44 }
 0xedd   :  { %v3532_v47 = vpack.c.bf16 %v3617_v45, %v3616_v46  ;;  %v3842_v48 = vpop.eup %3841  ;;  %v3709_v46 = vld [vmem:[#allocation13] sm:$0xff]  }
 0xede   :  { %v1994_v53 = vmul.f32 %v3842_v48, %v3838_v37  ;;  %v3711_v48 = vld [vmem:[#allocation13 + $0x10] sm:$0xff]  }
 0xedf   :  { %3534 = vmatprep.subr.msk.bf16.mxu1 %vm4391_vm1, %v3532_v47 }
 0xee1   :  { %v3844_v49 = vpop.eup %3843 }
 0xee2   :  { %v1993_v50 = vmul.f32 %v3844_v49, %v3840_v39  ;;  %v3712_v49 = vld [vmem:[#allocation13 + $0x18] sm:$0xff]  }
 0xee4   :  { %3425 = vmatprep.mubr.msk.f32.mxu1 %vm752_vm2, %v1993_v50  ;;  %v3713_v50 = vld [vmem:[#allocation13 + $0x20] sm:$0xff]  }
 0xee5   :  { %3426 = vmatmul.mubr.msk.f32.vlgmr.msra.gmra.mrb[24].mxu1 %vm752_vm2, %v1994_v53  ;;  %v3714_v53 = vld [vmem:[#allocation13 + $0x28] sm:$0xff]  }
 0xee6   :  { %3537 = vmatpush3.bf16.xpose.msk.msra.mxu1 %vm4391_vm1, %v3532_v47  ;;  %3432 = vmatprep.mubr.msk.f32.mxu1 %vm664_vm0, %v2083_v34  ;;  %v3710_v47 = vld [vmem:[#allocation13 + $0x8] sm:$0xff]   ;;  %v3715_v34 = vld [vmem:[#allocation13 + $0x30] sm:$0xff]  }
 0xeed   :  { %3433 = vmatmul.mubr.msk.f32.vlgmr.msra.gmra.mrb[26].mxu1 %vm664_vm0, %v2085_v16  ;;  %v3716_v16 = vld [vmem:[#allocation13 + $0x38] sm:$0xff]  }
 0xeee   :  { %2696 = vmatprep.mubr.bf16.mxu1 %v4146_v40 }
 0xfb8   :  { %v3427_v54 = vpop.f32.mrb[24].mxu1 }
 0xfb9   :  { %v2073_v55 = vpop.f32.mrb[25].mxu1 }
 0xfba   :  { %v3643_v17 = vpack.i.bf16 %v3427_v54, %v2073_v55 }
 0xfc0   :  { %v3434_v56 = vpop.f32.mrb[26].mxu1 }
 0xfc1   :  { %v2170_v57 = vadd.f32 %v3434_v56, %v4420_v18  ;;  %v2164_v58 = vpop.f32.mrb[27].mxu1 }
 0xfc2   :  { %v2165_v61 = vadd.f32 %v2164_v58, %v4425_v19 }
 0xfc3   :  { %v2176_v62 = vsel %vm752_vm2, %v2170_v57, -inf }
 0xfc4   :  { %2177 = vmax.xlane.f32.xlu0 %v2176_v62  ;;  %v2173_v43 = vsel %vm752_vm2, %v2165_v61, -inf }
 0xfc5   :  { %2174 = vmax.xlane.f32.xlu1 %v2173_v43 }
 0xfd6   :  { %3619 = vrot.lane.b32.xlu1 %v4411_v15, %s4148_s21 }
 0xfda   :  { %3629 = vrot.lane.b32.xlu1 %v3628_v11, %s4143_s6 }
 0xfde   :  { %3634 = vrot.lane.b32.xlu1 %v3633_v12, %s4148_s21 }
 0xfe2   :  { %3639 = vrot.lane.b32.xlu1 %v3638_v38, %s4147_s1 }
0x1051   :  { %v2178_v18 = vpop.xlane.xlu0 %2177 }
0x1052   :  { %v2180_v19 = vsub.f32 %v2170_v57, %v2178_v18  ;;  %v2175_v63 = vpop.xlane.xlu1 %2174  ;;  %v3717_v18 = vld [vmem:[#allocation14] ss:$16 sps:$4 sm:$0xff]  }
0x1053   :  { %v2179_v3 = vsub.f32 %v2165_v61, %v2175_v63  ;;  %v3720_v63 = vld [vmem:[#allocation14 + $0x8] ss:$16 sps:$4 sm:$0xff]  }
0x1054   :  { %v2183_v15 = vmul.f32 1.442695, %v2180_v19  ;;  %v3719_v19 = vld [vmem:[#allocation14 + $0x4] ss:$16 sps:$4 sm:$0xff]  }
0x1055   :  { %v2181_v4 = vmul.f32 1.442695, %v2179_v3  ;;  %v3722_v3 = vld [vmem:[#allocation14 + $0xc] ss:$16 sps:$4 sm:$0xff]   ;;  %2664 = vmatprep.subr.bf16.mxu1 %v3719_v19 }
0x1056   :  { %v3620_v20 = vpop.permute.xlu1 %3619  ;;  %2665 = vmatpush1.bf16.msra.mxu1 %v3717_v18  ;;  %v3141_v18 = vld [vmem:[%s4708_s9] ss:$0 sm:$0xff]  ;;  %s4149_s9 = smov [#allocation17]  }
0x1057   :  { %3845 = vpow2.f32 %v2181_v4  ;;  %v3622_v5 = vunpack.i.h.bf16 %v3620_v20  ;;  %v3621_v10 = vunpack.i.l.bf16 %v3620_v20  ;;  %v3728_v4 = vld [vmem:[#allocation14 + $0x2c] ss:$16 sps:$4 sm:$0xff]   ;;  %v3723_v20 = vld [vmem:[#allocation14 + $0x20] ss:$16 sps:$4 sm:$0xff]   ;;  %s3028_s23 = sshll.u32 %s4149_s9, 4  ;;  %s3029_s23 = int_to_ptr.vmem [resolvable:$true] %s3028_s23 }
0x1058   :  { %3847 = vpow2.f32 %v2183_v15  ;;  %v3725_v15 = vld [vmem:[#allocation14 + $0x24] ss:$16 sps:$4 sm:$0xff]   ;;  %p4100_p3 = scmp.lt.s32.totalorder %s3029_s23, %s3029_s23 }
0x1059   :  { %v3538_v11 = vpack.c.bf16 %v3622_v5, %v3621_v10  ;;  %2666 = vmatprep.subr.bf16.mxu1 %v3725_v15  ;;  %v3726_v5 = vld [vmem:[#allocation14 + $0x28] ss:$16 sps:$4 sm:$0xff]   ;;  %v3731_v10 = vld [vmem:[#allocation14 + $0x44] ss:$16 sps:$4 sm:$0xff]  }
0x105a   :  { %v3630_v21 = vpop.permute.xlu1 %3629  ;;  %2667 = vmatpush1.bf16.msra.mxu1 %v3723_v20 }
0x105b   :  { %3539 = vmatprep.subr.bf16.mxu0 %v3538_v11  ;;  %v3632_v30 = vunpack.i.h.bf16 %v3630_v21  ;;  %v3631_v31 = vunpack.i.l.bf16 %v3630_v21  ;;  %v3729_v21 = vld [vmem:[#allocation14 + $0x40] ss:$16 sps:$4 sm:$0xff]   ;;  %2668 = vmatprep.subr.bf16.mxu1 %v3731_v10 }
0x105c   :  { %3541 = vmatpush3.bf16.msra.mxu0 %v3538_v11  ;;  %v3734_v11 = vld [vmem:[#allocation14 + $0x4c] ss:$16 sps:$4 sm:$0xff]  }
0x105d   :  { %3442 = vmatprep.subr.bf16.mxu0 %v3709_v46 }
0x105e   :  { %v3635_v7 = vpop.permute.xlu1 %3634  ;;  %2669 = vmatpush1.bf16.msra.mxu1 %v3729_v21 }
0x105f   :  { %v3637_v0 = vunpack.i.h.bf16 %v3635_v7  ;;  %v3636_v12 = vunpack.i.l.bf16 %v3635_v7  ;;  %v3732_v7 = vld [vmem:[#allocation14 + $0x48] ss:$16 sps:$4 sm:$0xff]  }
0x1061   :  { %v3846_v51 = vpop.eup %3845  ;;  %v2307_v52 = vsel %vm664_vm0, %v4555_v27, %v3637_v0  ;;  %v2306_v38 = vsel %vm664_vm0, %v4557_v28, %v3636_v12 }
0x1062   :  { %v2185_v14 = vsel %vm752_vm2, %v3846_v51, 0.0  ;;  %v3848_v22 = vpop.eup %3847  ;;  %v3640_v25 = vpop.permute.xlu1 %3639 }
0x1063   :  { %2186 = vadd.xlane.f32.xlu0 %v2185_v14  ;;  %v2188_v23 = vsel %vm752_vm2, %v3848_v22, 0.0  ;;  %v3642_v33 = vunpack.i.h.bf16 %v3640_v25  ;;  %v3641_v35 = vunpack.i.l.bf16 %v3640_v25 }
0x1067   :  { %2189 = vadd.xlane.f32.xlu0 %v2188_v23 }
0x107d   :  { %3624 = vrot.lane.b32.xlu0 %v3623_v2, %s4148_s21 }
0x1081   :  { %3644 = vrot.lane.b32.xlu0 %v3643_v17, %s4143_s6  ;;  %s4095_s6 = scalar_lea.vmem %s3029_s23, 512 }
0x1082   :  { %p4096_p2 = scmp.ne.s32.totalorder %s3029_s23, %s4095_s6  ;;  %p4101_p4 = scmp.lt.s32.totalorder %s4095_s6, %s4095_s6 }
0x1084   :  { %p4102_p5 = por %p4101_p4, %p4100_p3 }
0x1086   :  { %p4103_p6 = pnand %p4102_p5, %p4096_p2 }
0x10f0   :  { %v2187_v24 = vpop.xlane.xlu0 %2186 }
0x10f1   :  { %3849 = vrcp.f32 %v2187_v24  ;;  %v3895_v24 = vld [vmem:[#allocation2 + $0x8] sm:$0xff] }
0x10f4   :  { %v2190_v27 = vpop.xlane.xlu0 %2189 }
0x10f5   :  { %3851 = vrcp.f32 %v2190_v27 }
0x10f8   :  { %v3625_v28 = vpop.permute.xlu0 %3624 }
0x10f9   :  { %v3627_v26 = vunpack.i.h.bf16 %v3625_v28  ;;  %v3626_v29 = vunpack.i.l.bf16 %v3625_v28 }
0x10fb   :  { %v3850_v32 = vpop.eup %3849  ;;  %v1483_v8 = vsel %vm664_vm0, %v4459_v59, %v3627_v26  ;;  %v1482_v9 = vsel %vm664_vm0, %v4461_v60, %v3626_v29  ;;  %v3896_v26 = vld [vmem:[#allocation2 + $0x18] sm:$0xff] }
0x10fc   :  { %v3645_v2 = vpop.permute.xlu0 %3644  ;;  %v2193_v13 = vmul.f32 %v3850_v32, %v3846_v51  ;;  %v1485_v36 = vsel %vm1484_vm3, %v1482_v9, %v3631_v31  ;;  %v1486_v37 = vsel %vm1484_vm3, %v1483_v8, %v3632_v30  ;;  %v3893_v51 = vld [vmem:[#allocation2] sm:$0xff]  ;;  %v3738_v8 = vld [vmem:[#allocation14 + $0x68] ss:$16 sps:$4 sm:$0xff]  }
0x10fd   :  { %v3647_v6 = vunpack.i.h.bf16 %v3645_v2  ;;  %v3646_v39 = vunpack.i.l.bf16 %v3645_v2  ;;  %v1488_v1 = vsel %vm1487_vm4, %v1485_v36, %v3641_v35  ;;  %v1489_v41 = vsel %vm1487_vm4, %v1486_v37, %v3642_v33  ;;  %v3737_v32 = vld [vmem:[#allocation14 + $0x64] ss:$16 sps:$4 sm:$0xff]   ;;  %v3740_v33 = vld [vmem:[#allocation14 + $0x6c] ss:$16 sps:$4 sm:$0xff]   ;;  %v3735_v35 = vld [vmem:[#allocation14 + $0x60] ss:$16 sps:$4 sm:$0xff]  }
0x10fe   :  { %3439 = vmatprep.mubr.msk.f32.mxu0 %vm752_vm2, %v2193_v13  ;;  %v2312_v42 = vpack.c.bf16 %v1489_v41, %v1488_v1  ;;  %2670 = vmatprep.subr.bf16.mxu1 %v3737_v32  ;;  %v3743_v9 = vld [vmem:[#allocation14 + $0x84] ss:$16 sps:$4 sm:$0xff]   ;;  %v3746_v2 = vld [vmem:[#allocation14 + $0x8c] ss:$16 sps:$4 sm:$0xff]   ;;  %v3741_v13 = vld [vmem:[#allocation14 + $0x80] ss:$16 sps:$4 sm:$0xff]  }
0x10ff   :  { %v3852_v44 = vpop.eup %3851  ;;  %v2308_v59 = vsel %vm1484_vm3, %v2306_v38, %v3646_v39  ;;  %v2309_v60 = vsel %vm1484_vm3, %v2307_v52, %v3647_v6  ;;  %2671 = vmatpush1.bf16.msra.mxu1 %v3735_v35  ;;  %v3744_v36 = vld [vmem:[#allocation14 + $0x88] ss:$16 sps:$4 sm:$0xff]   ;;  %v3749_v37 = vld [vmem:[#allocation14 + $0xa4] ss:$16 sps:$4 sm:$0xff]   ;;  %v3752_v6 = vld [vmem:[#allocation14 + $0xac] ss:$16 sps:$4 sm:$0xff]  }
0x1100   :  { %v2194_v45 = vmul.f32 %v3852_v44, %v3848_v22  ;;  %v3894_v22 = vld [vmem:[#allocation2 + $0x10] sm:$0xff]  ;;  %2672 = vmatprep.subr.bf16.mxu1 %v3743_v9  ;;  %v3750_v1 = vld [vmem:[#allocation14 + $0xa8] ss:$16 sps:$4 sm:$0xff]  }
0x1101   :  { %v3747_v39 = vld [vmem:[#allocation14 + $0xa0] ss:$16 sps:$4 sm:$0xff]   ;;  %v3756_v44 = vld [vmem:[#allocation14 + $0xc8] ss:$16 sps:$4 sm:$0xff]  }
0x1102   :  { %3440 = vmatmul.mubr.msk.f32.vlgmr.msra.gmra.mrb[22].mxu0 %vm752_vm2, %v2194_v45  ;;  %v3753_v41 = vld [vmem:[#allocation14 + $0xc0] ss:$16 sps:$4 sm:$0xff]   ;;  %v3764_v45 = vld [vmem:[#allocation14 + $0xec] ss:$16 sps:$4 sm:$0xff]  }
0x1103   :  { %3458 = vmatprep.mubr.bf16.mxu0 %v2312_v42  ;;  %3443 = vmatpush3.bf16.msra.mxu0 %v3709_v46  ;;  %v3755_v42 = vld [vmem:[#allocation14 + $0xc4] ss:$16 sps:$4 sm:$0xff]   ;;  %v3759_v46 = vld [vmem:[#allocation14 + $0xe0] ss:$16 sps:$4 sm:$0xff]   ;;  %v3780_v35 = vld [vmem:[#allocation16 + $0x38] sm:$0xff]  }
0x1104   :  { %3444 = vmatprep.subr.bf16.mxu0 %v3710_v47  ;;  %2673 = vmatpush1.bf16.msra.mxu1 %v3741_v13  ;;  %v3778_v32 = vld [vmem:[#allocation16 + $0x30] sm:$0xff]  }
0x1105   :  { %2674 = vmatprep.subr.bf16.mxu1 %v3749_v37 }
0x1107   :  { %3445 = vmatpush3.bf16.msra.mxu0 %v3710_v47  ;;  %v3762_v47 = vld [vmem:[#allocation14 + $0xe8] ss:$16 sps:$4 sm:$0xff]  }
0x1108   :  { %3446 = vmatprep.subr.bf16.mxu0 %v3711_v48  ;;  %2675 = vmatpush1.bf16.msra.mxu1 %v3747_v39 }
0x1109   :  { %2676 = vmatprep.subr.bf16.mxu1 %v3755_v42 }
0x110b   :  { %3447 = vmatpush3.bf16.msra.mxu0 %v3711_v48 }
0x110c   :  { %3448 = vmatprep.subr.bf16.mxu0 %v3712_v49  ;;  %2677 = vmatpush1.bf16.msra.mxu1 %v3753_v41 }
0x110f   :  { %3449 = vmatpush3.bf16.msra.mxu0 %v3712_v49 }
0x1110   :  { %3450 = vmatprep.subr.bf16.mxu0 %v3713_v50 }
0x1113   :  { %3451 = vmatpush3.bf16.msra.mxu0 %v3713_v50 }
0x1114   :  { %3452 = vmatprep.subr.bf16.mxu0 %v3714_v53 }
0x1117   :  { %3453 = vmatpush3.bf16.msra.mxu0 %v3714_v53 }
0x1118   :  { %3454 = vmatprep.subr.bf16.mxu0 %v3715_v34 }
0x111b   :  { %3455 = vmatpush3.bf16.msra.mxu0 %v3715_v34 }
0x111c   :  { %3456 = vmatprep.subr.bf16.mxu0 %v3716_v16 }
0x111f   :  { %3457 = vmatpush3.bf16.msra.mxu0 %v3716_v16 }
0x1120   :  { %2717 = vmatprep.subr.bf16.mxu0 %v3722_v3 }
0x11d5   :  { %v3441_v54 = vpop.f32.mrb[22].mxu0 }
0x11d6   :  { %v2273_v55 = vpop.f32.mrb[23].mxu0 }
0x11d7   :  { %v3648_v17 = vpack.i.bf16 %v3441_v54, %v2273_v55 }
0x11d9   :  { %3649 = vrot.lane.b32.xlu1 %v3648_v17, %s4147_s1 }
0x124b   :  { %v3650_v56 = vpop.permute.xlu1 %3649 }
0x124c   :  { %v3652_v57 = vunpack.i.h.bf16 %v3650_v56  ;;  %v3651_v58 = vunpack.i.l.bf16 %v3650_v56 }
0x124e   :  { %v2311_v61 = vsel %vm1487_vm4, %v2309_v60, %v3652_v57  ;;  %v2310_v62 = vsel %vm1487_vm4, %v2308_v59, %v3651_v58  ;;  %v3758_v59 = vld [vmem:[#allocation14 + $0xcc] ss:$16 sps:$4 sm:$0xff]   ;;  %v3761_v60 = vld [vmem:[#allocation14 + $0xe4] ss:$16 sps:$4 sm:$0xff]  }
0x124f   :  { %v2313_v43 = vpack.c.bf16 %v2311_v61, %v2310_v62  ;;  %2678 = vmatprep.subr.bf16.mxu1 %v3761_v60 }
0x1250   :  { %2679 = vmatpush1.bf16.msra.mxu1 %v3759_v46 }
0x1251   :  { %3459 = vmatmul.mubr.bf16.vlgmr.msra.gmra.mrb[24].mxu0 %v2313_v43 }
0x1252   :  { %2749 = vmatprep.mubr.bf16.mxu0 %v4146_v40  ;;  %2718 = vmatpush1.bf16.msra.mxu0 %v3720_v63 }
0x1253   :  { %2719 = vmatprep.subr.bf16.mxu0 %v3728_v4 }
0x1256   :  { %2720 = vmatpush1.bf16.msra.mxu0 %v3726_v5 }
0x1257   :  { %2721 = vmatprep.subr.bf16.mxu0 %v3734_v11 }
0x125a   :  { %2722 = vmatpush1.bf16.msra.mxu0 %v3732_v7 }
0x125b   :  { %2723 = vmatprep.subr.bf16.mxu0 %v3740_v33  ;;  %v3779_v33 = vld [vmem:[#allocation16 + $0x78] sm:$0xff]  }
0x125e   :  { %2724 = vmatpush1.bf16.msra.mxu0 %v3738_v8 }
0x125f   :  { %2725 = vmatprep.subr.bf16.mxu0 %v3746_v2 }
0x1262   :  { %2726 = vmatpush1.bf16.msra.mxu0 %v3744_v36 }
0x1263   :  { %2727 = vmatprep.subr.bf16.mxu0 %v3752_v6 }
0x1266   :  { %2728 = vmatpush1.bf16.msra.mxu0 %v3750_v1 }
0x1267   :  { %2729 = vmatprep.subr.bf16.mxu0 %v3758_v59 }
0x126a   :  { %2730 = vmatpush1.bf16.msra.mxu0 %v3756_v44 }
0x126b   :  { %2731 = vmatprep.subr.bf16.mxu0 %v3764_v45 }
0x126e   :  { %2732 = vmatpush1.bf16.msra.mxu0 %v3762_v47 }
0x1324   :  { %v3460_v0 = vpop.f32.mrb[24].mxu0 }
0x1325   :  { %v2412_v12 = vpop.f32.mrb[25].mxu0  ;;  %v4657_v23 = vadd.f32 %v3894_v22, %v3460_v0  ;;  %v3765_v0 = vld [vmem:[#allocation16 + $0x40] sm:$0xff]   ;;  %v3770_v22 = vld [vmem:[#allocation16 + $0x10] sm:$0xff]  }
0x1326   :  { %v4655_v52 = vadd.f32 %v3893_v51, %v2412_v12  ;;  %v3461_v38 = vpop.f32.mrb[26].mxu0  ;;  %v3766_v12 = vld [vmem:[#allocation16] sm:$0xff]   ;;  %3282 = vmatprep.subr.bf16.mxu1 %v3765_v0  ;;  %v3767_v51 = vld [vmem:[#allocation16 + $0x48] sm:$0xff]  }
0x1327   :  { %v2415_v14 = vpop.f32.mrb[27].mxu0  ;;  %v4665_v29 = vadd.f32 %v3896_v26, %v3461_v38  ;;  %v2433_v30 = vmul.f32 %v4657_v23, %v4657_v23  ;;  %v3768_v38 = vld [vmem:[#allocation16 + $0x8] sm:$0xff]  }
0x1328   :  { %v4659_v27 = vadd.f32 %v3895_v24, %v2415_v14  ;;  %v2431_v25 = vmul.f32 %v4655_v52, %v4655_v52  ;;  %v3769_v14 = vld [vmem:[#allocation16 + $0x50] sm:$0xff]   ;;  %v3771_v24 = vld [vmem:[#allocation16 + $0x58] sm:$0xff]   ;;  %v3775_v26 = vld [vmem:[#allocation16 + $0x68] sm:$0xff]  }
0x1329   :  { %v2434_v31 = vmul.f32 %v4665_v29, %v4665_v29 }
0x132a   :  { %2435 = vadd.xlane.f32.xlu0 %v2431_v25  ;;  %v2432_v28 = vmul.f32 %v4659_v27, %v4659_v27  ;;  %v3772_v25 = vld [vmem:[#allocation16 + $0x18] sm:$0xff]  }
0x132c   :  { %2437 = vadd.xlane.f32.xlu1 %v2432_v28  ;;  %v3774_v28 = vld [vmem:[#allocation16 + $0x20] sm:$0xff]  }
0x132e   :  { %2439 = vadd.xlane.f32.xlu0 %v2433_v30  ;;  %v3776_v30 = vld [vmem:[#allocation16 + $0x28] sm:$0xff]  }
0x1332   :  { %2441 = vadd.xlane.f32.xlu0 %v2434_v31  ;;  %v3777_v31 = vld [vmem:[#allocation16 + $0x70] sm:$0xff]  }
0x13b7   :  { %v2436_v48 = vpop.xlane.xlu0 %2435 }
0x13b8   :  { %v2443_v49 = vmul.f32 0.0078125, %v2436_v48 }
0x13b9   :  { %v2438_v50 = vpop.xlane.xlu1 %2437 }
0x13ba   :  { %v2447_v53 = vadd.f32 1e-06, %v2443_v49  ;;  %v2444_v34 = vmul.f32 0.0078125, %v2438_v50 }
0x13bb   :  { %v2440_v16 = vpop.xlane.xlu0 %2439 }
0x13bc   :  { %3853 = vrsqrt.f32 %v2447_v53  ;;  %v2448_v54 = vadd.f32 1e-06, %v2444_v34  ;;  %v2445_v55 = vmul.f32 0.0078125, %v2440_v16 }
0x13be   :  { %3855 = vrsqrt.f32 %v2448_v54  ;;  %v2449_v17 = vadd.f32 1e-06, %v2445_v55 }
0x13bf   :  { %v2442_v56 = vpop.xlane.xlu0 %2441 }
0x13c0   :  { %v2446_v57 = vmul.f32 0.0078125, %v2442_v56  ;;  %3857 = vrsqrt.f32 %v2449_v17 }
0x13c2   :  { %v2450_v58 = vadd.f32 1e-06, %v2446_v57 }
0x13c4   :  { %3859 = vrsqrt.f32 %v2450_v58 }
0x13c6   :  { %v3854_v61 = vpop.eup %3853 }
0x13c7   :  { %v2455_v62 = vmul.f32 %v3854_v61, %v4655_v52 }
0x13c8   :  { %v3856_v43 = vpop.eup %3855 }
0x13c9   :  { %v2456_v19 = vmul.f32 %v3856_v43, %v4659_v27  ;;  %v2466_v63 = vmul.f32 %v3141_v18, %v2455_v62 }
0x13ca   :  { %v3858_v15 = vpop.eup %3857 }
0x13cb   :  { %v2467_v3 = vmul.f32 %v3141_v18, %v2456_v19  ;;  %v2457_v5 = vmul.f32 %v3858_v15, %v4657_v23 }
0x13cd   :  { %v2470_v4 = vpack.c.bf16 %v2467_v3, %v2466_v63  ;;  %v2468_v21 = vmul.f32 %v3141_v18, %v2457_v5 }
0x13ce   :  { %v3860_v20 = vpop.eup %3859 }
0x13cf   :  { %2697 = vmatmul.mubr.bf16.vlgmr.msra.gmra.mrb[28].mxu1 %v2470_v4  ;;  %2750 = vmatmul.mubr.bf16.vlgmr.msra.gmra.mrb[28].mxu0 %v2470_v4  ;;  %v2458_v10 = vmul.f32 %v3860_v20, %v4665_v29 }
0x13d0   :  { %2706 = vmatprep.mubr.bf16.mxu1 %v4146_v40  ;;  %2759 = vmatprep.mubr.bf16.mxu0 %v4146_v40  ;;  %v3773_v40 = vld [vmem:[#allocation16 + $0x60] sm:$0xff]  }
0x13d1   :  { %v2469_v11 = vmul.f32 %v3141_v18, %v2458_v10  ;;  %3283 = vmatpush3.bf16.msra.mxu1 %v3766_v12 }
0x13d2   :  { %3284 = vmatprep.subr.bf16.mxu1 %v3767_v51 }
0x13d3   :  { %v2471_v7 = vpack.c.bf16 %v2469_v11, %v2468_v21 }
0x13d5   :  { %3285 = vmatpush3.bf16.msra.mxu1 %v3768_v38 }
0x13d6   :  { %3286 = vmatprep.subr.bf16.mxu1 %v3769_v14 }
0x13d7   :  { %2707 = vmatmul.mubr.bf16.gmra.mrb[32].mxu1 %v2471_v7  ;;  %2760 = vmatmul.mubr.bf16.gmra.mrb[32].mxu0 %v2471_v7 }
0x13d9   :  { %3287 = vmatpush3.bf16.msra.mxu1 %v3770_v22 }
0x13da   :  { %3288 = vmatprep.subr.bf16.mxu1 %v3771_v24 }
0x13dd   :  { %3289 = vmatpush3.bf16.msra.mxu1 %v3772_v25 }
0x13de   :  { %3290 = vmatprep.subr.bf16.mxu1 %v3773_v40 }
0x13e1   :  { %3291 = vmatpush3.bf16.msra.mxu1 %v3774_v28 }
0x13e2   :  { %3292 = vmatprep.subr.bf16.mxu1 %v3775_v26 }
0x13e5   :  { %3293 = vmatpush3.bf16.msra.mxu1 %v3776_v30 }
0x13e6   :  { %3294 = vmatprep.subr.bf16.mxu1 %v3777_v31 }
0x13e9   :  { %3295 = vmatpush3.bf16.msra.mxu1 %v3778_v32 }
0x13ea   :  { %3296 = vmatprep.subr.bf16.mxu1 %v3779_v33 }
0x13ed   :  { %3297 = vmatpush3.bf16.msra.mxu1 %v3780_v35 }
0x14a2   :  { %v2698_v8 = vpop.f32.mrb[28].mxu1  ;;  %v2751_v9 = vpop.f32.mrb[28].mxu0 }
0x14a3   :  { %v3174_v2 = vmul.f32 -1.442695, %v2698_v8  ;;  %v2700_v13 = vpop.f32.mrb[29].mxu1  ;;  %v2753_v36 = vpop.f32.mrb[29].mxu0 }
0x14a4   :  { %v3175_v37 = vmul.f32 -1.442695, %v2700_v13  ;;  %v2702_v6 = vpop.f32.mrb[30].mxu1  ;;  %v2755_v39 = vpop.f32.mrb[30].mxu0 }
0x14a5   :  { %3861 = vpow2.f32 %v3174_v2  ;;  %v3176_v1 = vmul.f32 -1.442695, %v2702_v6  ;;  %v2704_v41 = vpop.f32.mrb[31].mxu1  ;;  %v2757_v42 = vpop.f32.mrb[31].mxu0 }
0x14a6   :  { %3863 = vpow2.f32 %v3175_v37  ;;  %v3177_v44 = vmul.f32 -1.442695, %v2704_v41 }
0x14a7   :  { %3865 = vpow2.f32 %v3176_v1 }
0x14a8   :  { %3867 = vpow2.f32 %v3177_v44 }
0x14aa   :  { %v2708_v59 = vpop.f32.mrb[32].mxu1  ;;  %v2761_v60 = vpop.f32.mrb[32].mxu0 }
0x14ab   :  { %v3178_v45 = vmul.f32 -1.442695, %v2708_v59  ;;  %v2710_v46 = vpop.f32.mrb[33].mxu1  ;;  %v2763_v47 = vpop.f32.mrb[33].mxu0 }
0x14ac   :  { %v3179_v48 = vmul.f32 -1.442695, %v2710_v46  ;;  %v2712_v49 = vpop.f32.mrb[34].mxu1  ;;  %v2765_v50 = vpop.f32.mrb[34].mxu0 }
0x14ad   :  { %3869 = vpow2.f32 %v3178_v45  ;;  %v3180_v53 = vmul.f32 -1.442695, %v2712_v49  ;;  %v2714_v34 = vpop.f32.mrb[35].mxu1  ;;  %v2767_v16 = vpop.f32.mrb[35].mxu0 }
0x14ae   :  { %3871 = vpow2.f32 %v3179_v48  ;;  %v3181_v54 = vmul.f32 -1.442695, %v2714_v34 }
0x14af   :  { %v3862_v55 = vpop.eup %3861  ;;  %3873 = vpow2.f32 %v3180_v53 }
0x14b0   :  { %v3864_v17 = vpop.eup %3863  ;;  %v2794_v56 = vadd.f32 1.0, %v3862_v55  ;;  %3875 = vpow2.f32 %v3181_v54 }
0x14b1   :  { %v3866_v57 = vpop.eup %3865  ;;  %v2795_v58 = vadd.f32 1.0, %v3864_v17 }
0x14b2   :  { %v3868_v61 = vpop.eup %3867  ;;  %3877 = vrcp.f32 %v2794_v56  ;;  %v2796_v62 = vadd.f32 1.0, %v3866_v57 }
0x14b3   :  { %3879 = vrcp.f32 %v2795_v58  ;;  %v2797_v43 = vadd.f32 1.0, %v3868_v61 }
0x14b4   :  { %3881 = vrcp.f32 %v2796_v62 }
0x14b5   :  { %3883 = vrcp.f32 %v2797_v43 }
0x14b7   :  { %v3870_v18 = vpop.eup %3869 }
0x14b8   :  { %v3872_v19 = vpop.eup %3871  ;;  %v2798_v63 = vadd.f32 1.0, %v3870_v18 }
0x14b9   :  { %v3874_v3 = vpop.eup %3873  ;;  %v2799_v15 = vadd.f32 1.0, %v3872_v19 }
0x14ba   :  { %v3876_v4 = vpop.eup %3875  ;;  %3885 = vrcp.f32 %v2798_v63  ;;  %v2800_v20 = vadd.f32 1.0, %v3874_v3 }
0x14bb   :  { %3887 = vrcp.f32 %v2799_v15  ;;  %v2801_v5 = vadd.f32 1.0, %v3876_v4 }
0x14bc   :  { %v3878_v10 = vpop.eup %3877  ;;  %3889 = vrcp.f32 %v2800_v20 }
0x14bd   :  { %v3880_v11 = vpop.eup %3879  ;;  %v2818_v21 = vmul.f32 %v3878_v10, %v2698_v8  ;;  %3891 = vrcp.f32 %v2801_v5 }
0x14be   :  { %v3882_v7 = vpop.eup %3881  ;;  %v2819_v0 = vmul.f32 %v3880_v11, %v2700_v13 }
0x14bf   :  { %v3884_v12 = vpop.eup %3883  ;;  %v2826_v51 = vmul.f32 %v2818_v21, %v2751_v9  ;;  %v2820_v38 = vmul.f32 %v3882_v7, %v2702_v6 }
0x14c0   :  { %v2827_v14 = vmul.f32 %v2819_v0, %v2753_v36  ;;  %v2821_v22 = vmul.f32 %v3884_v12, %v2704_v41 }
0x14c1   :  { %v2828_v24 = vmul.f32 %v2820_v38, %v2755_v39 }
0x14c2   :  { %v2829_v25 = vmul.f32 %v2821_v22, %v2757_v42 }
0x14c3   :  { %v2834_v40 = vpack.c.bf16 %v2828_v24, %v2826_v51 }
0x14c4   :  { %v3886_v28 = vpop.eup %3885  ;;  %v2835_v26 = vpack.c.bf16 %v2829_v25, %v2827_v14 }
0x14c5   :  { %v3888_v30 = vpop.eup %3887  ;;  %v2822_v31 = vmul.f32 %v3886_v28, %v2708_v59 }
0x14c6   :  { %v3890_v32 = vpop.eup %3889  ;;  %v2823_v33 = vmul.f32 %v3888_v30, %v2710_v46  ;;  %2998 = vmatprep.mubr.bf16.mxu1 %v2835_v26 }
0x14c7   :  { %v3892_v35 = vpop.eup %3891  ;;  %v2830_v8 = vmul.f32 %v2822_v31, %v2761_v60  ;;  %v2824_v2 = vmul.f32 %v3890_v32, %v2712_v49  ;;  %2999 = vmatmul.mubr.bf16.vlgmr.msra.gmra.mrb[36].mxu1 %v2834_v40 }
0x14c8   :  { %v2831_v13 = vmul.f32 %v2823_v33, %v2763_v47  ;;  %v2825_v37 = vmul.f32 %v3892_v35, %v2714_v34 }
0x14c9   :  { %v2832_v9 = vmul.f32 %v2824_v2, %v2765_v50 }
0x14ca   :  { %v2833_v6 = vmul.f32 %v2825_v37, %v2767_v16 }
0x14cb   :  { %v2836_v36 = vpack.c.bf16 %v2832_v9, %v2830_v8 }
0x14cc   :  { %v2837_v1 = vpack.c.bf16 %v2833_v6, %v2831_v13 }
0x14ce   :  { %3006 = vmatprep.mubr.bf16.mxu1 %v2837_v1 }
0x14cf   :  { %3007 = vmatmul.mubr.bf16.gmra.mrb[40].mxu1 %v2836_v36 }
0x159a   :  { %v3298_v39 = vpop.f32.mrb[36].mxu1 }
0x159b   :  { %v3299_v41 = vpop.f32.mrb[37].mxu1 }
0x159c   :  { %v3300_v42 = vadd.f32 %v3299_v41, %v3298_v39  ;;  %v3301_v44 = vpop.f32.mrb[38].mxu1 }
0x159d   :  { %v3302_v59 = vpop.f32.mrb[39].mxu1 }
0x159e   :  { %v3015_v45 = vadd.f32 %v3300_v42, %v4655_v52  ;;  %v3303_v46 = vadd.f32 %v3302_v59, %v3301_v44 }
0x15a0   :  { %3019 = vst [vmem:[#allocation17] sm:$0xff] %v3015_v45  ;;  %v3016_v60 = vadd.f32 %v3303_v46, %v4659_v27 }
0x15a2   :  { %3020 = vst [vmem:[#allocation17 + $0x8] sm:$0xff] %v3016_v60  ;;  %v3304_v47 = vpop.f32.mrb[40].mxu1 }
0x15a3   :  { %v3305_v48 = vpop.f32.mrb[41].mxu1 }
0x15a4   :  { %v3306_v49 = vadd.f32 %v3305_v48, %v3304_v47  ;;  %v3307_v50 = vpop.f32.mrb[42].mxu1 }
0x15a5   :  { %v3308_v53 = vpop.f32.mrb[43].mxu1 }
0x15a6   :  { %v3017_v34 = vadd.f32 %v3306_v49, %v4657_v23  ;;  %v3309_v16 = vadd.f32 %v3308_v53, %v3307_v50 }
0x15a8   :  { %3021 = vst [vmem:[#allocation17 + $0x10] sm:$0xff] %v3017_v34  ;;  %v3018_v54 = vadd.f32 %v3309_v16, %v4665_v29 }
0x15aa   :  { %3022 = vst [vmem:[#allocation17 + $0x18] sm:$0xff] %v3018_v54 }
0x15ab   :  { %4106 = shalt.err (!%p4103_p6)
}
0x15ac   :  { %s4107_s27 = scalar_lea.hbm %s4711_s12, 512 }
0x15ad   :  { %p4108_p7 = scmp.ne.s32.totalorder %s4711_s12, %s4107_s27  ;;  %p4111_p8 = scmp.lt.u32.totalorder %s4107_s27, %s4711_s12 }
0x15af   :  { %p4113_p9 = pnand %p4111_p8, %p4108_p7 }
0x15b1   :  { %4116 = shalt.err (!%p4113_p9)
}
0x15b2   :  { %3034 = dma.vmem_to_hbm [thread:$0]  %s3029_s23, 512, %s4711_s12, [#allocation4], %s4134_s22, %s4134_s22, %s4135_s29  }
0x15b3   :  { %4127 = dma.done.wait [#allocation4], 512  }
0x15b4   :  { %4128 = vsyncadd [#allocation4], 4294966784 }
0x15b5   :  { %3038 = vsyncpa [#allocation3], 1 }
0x15b6   :  { %3039 = vsyncpa [#allocation6], 1 }
0x15b7   :  { %3040 = vsyncpa [#allocation9], 1 }
0x15b8   :  { %3041 = vsyncpa [#allocation12], 1 }
0x15b9   :  { %3042 = vsyncpa [#allocation15], 1 }
0x15ba   :  { %3043 = vsyncpa [#allocation4], 1 }

</bundles_post_ra>
